<compile_context>
chip_gen: v6e
topology: v6e:2x2x1
jax: 0.10.0
libtpu: 0.0.40
codegen_flags: <defaults>
</compile_context>

<pallas_src>
import jax
import jax.numpy as jnp
from jax.experimental import pallas as pl
from jax.experimental.pallas import tpu as pltpu


# --------------------------------------------------------------------------- kernel
def time_conditioning_kernel(t_ref, w1_ref, b1_ref, w2_ref, b2_ref, wp_ref, bp_ref,
                             temb_ref, proj_ref, temb_scratch):
    # t_ref:        (B,)      f32  in SMEM (scalar timesteps)
    # w1_ref:       (1, D)    f32  Linear(1, D) weight (transposed)
    # b1_ref:       (1, D)    f32
    # w2_ref:       (D, D)    bf16 Linear(D, D) weight, (in, out)
    # b2_ref:       (1, D)    f32
    # wp_ref:       (D, TN)   bf16 this step's contiguous chunk of concatenated
    #                              ResBlock time_mlp weights, (in, out)
    # bp_ref:       (1, TN)   f32  matching bias chunk
    # temb_ref:     (B, DC)   f32  this step's lane-aligned chunk of t_emb
    # proj_ref:     (B, TN)   f32  this step's chunk of all ResBlock time projections
    # temb_scratch: (B, D)    f32  VMEM scratch (only used when DC < D)
    b, dc = temb_ref.shape
    d = w2_ref.shape[0]

    # ---- TimeEmbedding: Linear(1, D) -> SiLU -> Linear(D, D) -----------------
    # Splat each SMEM scalar timestep into its own sublane row of a (B, D) tile.
    # O(B) scalar reads + selects; filler that hides under the weight DMA.
    row_ids = jax.lax.broadcasted_iota(jnp.int32, (b, d), 0)
    t_rows = jnp.zeros((b, d), jnp.float32)
    for r in range(b):
        t_rows = jnp.where(row_ids == r, t_ref[r], t_rows)

    h = t_rows * w1_ref[...] + b1_ref[...]        # Linear(1, D): K == 1 -> plain VPU f32
    h = h * jax.nn.sigmoid(h)                     # SiLU in f32 (EUP)
    # bf16 MXU operands, f32 accumulation.
    t_emb = jnp.dot(h.astype(jnp.bfloat16), w2_ref[...],
                    preferred_element_type=jnp.float32) + b2_ref[...]

    # This grid step owns one lane-aligned chunk of the t_emb output.
    if dc == d:
        temb_ref[...] = t_emb
    else:
        temb_scratch[...] = t_emb
        idx = pl.multiple_of(pl.program_id(0) * dc, 128)
        temb_ref[...] = temb_scratch[:, pl.ds(idx, dc)]

    # ---- All ResBlock time_mlps, batched: SiLU(t_emb) @ Wp_chunk + bp_chunk ---
    g = t_emb * jax.nn.sigmoid(t_emb)             # SiLU in f32
    proj_ref[...] = (jnp.dot(g.astype(jnp.bfloat16), wp_ref[...],
                             preferred_element_type=jnp.float32) + bp_ref[...])


# ------------------------------------------------------------------- weight layout
def prepare_time_conditioning_params(w1, b1, w2, b2, proj_ws, proj_bs, *,
                                     n_chunks=1, weight_dtype=jnp.bfloat16):
    """One-time weight layout (hoisted out of the per-diffusion-step path).

    PyTorch shapes: w1 (D,1), b1 (D,), w2 (D,D) [out,in], b2 (D,),
                    proj_ws[i] (out_ch_i, D), proj_bs[i] (out_ch_i,).

    Returns kernel-ready params (with n_chunks baked in via wp.shape[0]) and
    [(offset, out_ch_i)] slices into the concatenated projection output.
    """
    D = w2.shape[0]
    assert D % (128 * n_chunks) == 0, "time_dim must split into 128-lane chunks"

    w1_t = jnp.asarray(w1, jnp.float32).reshape(1, D)
    b1_r = jnp.asarray(b1, jnp.float32).reshape(1, D)
    w2_t = jnp.transpose(jnp.asarray(w2, jnp.float32)).astype(weight_dtype)   # (in, out)
    b2_r = jnp.asarray(b2, jnp.float32).reshape(1, D)

    wp = jnp.concatenate(
        [jnp.transpose(jnp.asarray(w, jnp.float32)) for w in proj_ws], axis=1)   # (D, N)
    bp = jnp.concatenate(
        [jnp.asarray(b, jnp.float32).reshape(1, -1) for b in proj_bs], axis=1)   # (1, N)
    n_total = wp.shape[1]

    # Pad N so it splits into `n_chunks` lane-aligned (multiple-of-128) blocks.
    align = 128 * n_chunks
    n_pad = ((n_total + align - 1) // align) * align
    if n_pad != n_total:
        wp = jnp.pad(wp, ((0, 0), (0, n_pad - n_total)))
        bp = jnp.pad(bp, ((0, 0), (0, n_pad - n_total)))
    tn = n_pad // n_chunks

    # (n_chunks, D, tn): each grid step's weight chunk is one contiguous HBM region.
    wp = wp.reshape(D, n_chunks, tn).transpose(1, 0, 2).astype(weight_dtype)
    bp = bp.reshape(1, n_chunks, tn).transpose(1, 0, 2)          # f32 bias stays f32

    slices, off = [], 0
    for w in proj_ws:
        slices.append((off, int(w.shape[0])))
        off += int(w.shape[0])
    return (w1_t, b1_r, w2_t, b2_r, wp, bp), slices


# ------------------------------------------------------------------ generation knobs
def _device_kind():
    try:
        return jax.devices()[0].device_kind.lower()
    except Exception:
        return ""


def _is_v7x():
    return "v7" in _device_kind()


def pick_n_chunks():
    # v5e/v6e: one TensorCore -> grid=(2,) would just serialize, duplicate the t_emb
    # recompute, pay extra grid-step overhead and stream padded zero columns.
    # v7x: two TensorCores -> split the lane-dense projection in two, one per core.
    return 2 if _is_v7x() else 1


# ----------------------------------------------------------------------- entry point
def time_conditioning(t, params, *, core_parallel=None):
    """t: (B,) -> (t_emb (B, D) f32, proj (B, N_pad) f32).

    proj[:, off:off+out_ch_i] is ResBlock i's time_mlp(t_emb); trailing padding
    columns (if any) are zero.  B can be many sampler timesteps at once — the
    weight DMA (the dominant cost) is then paid once instead of per step.
    """
    w1_t, b1_r, w2_t, b2_r, wp, bp = params
    n_chunks, D, tn = wp.shape
    n_pad = n_chunks * tn
    dc = D // n_chunks
    assert D % (128 * n_chunks) == 0

    B = t.shape[0]
    B_pad = ((B + 7) // 8) * 8                      # sublane alignment
    t_f32 = t.astype(jnp.float32)
    if B_pad != B:
        t_f32 = jnp.pad(t_f32, (0, B_pad - B))

    if core_parallel is None:
        core_parallel = (n_chunks > 1) and _is_v7x()
    if n_chunks == 1:
        sem = ("arbitrary",)
    elif core_parallel:
        # Guarantee the 2-step grid splits one chunk per TensorCore on v7x.
        sem = (pltpu.CORE_PARALLEL,)
    else:
        sem = ("parallel",)

    flops = 2 * B_pad * D + 2 * B_pad * D * D + 2 * B_pad * D * n_pad
    bytes_accessed = (4 * (B_pad + 3 * D + n_pad + B_pad * D + B_pad * n_pad)
                      + 2 * (D * D + D * n_pad))                 # bf16 weights
    cost = pl.CostEstimate(flops=int(flops),
                           transcendentals=int(2 * B_pad * D),
                           bytes_accessed=int(bytes_accessed))

    t_emb, proj = pl.pallas_call(
        time_conditioning_kernel,
        grid=(n_chunks,),
        out_shape=(jax.ShapeDtypeStruct((B_pad, D), jnp.float32),
                   jax.ShapeDtypeStruct((B_pad, n_pad), jnp.float32)),
        in_specs=[
            pl.BlockSpec(memory_space=pltpu.MemorySpace.SMEM),   # t: scalars in SMEM
            pl.BlockSpec((1, D), lambda i: (0, 0)),              # w1 (1, D)  f32
            pl.BlockSpec((1, D), lambda i: (0, 0)),              # b1         f32
            pl.BlockSpec((D, D), lambda i: (0, 0)),              # w2 (in,out) bf16
            pl.BlockSpec((1, D), lambda i: (0, 0)),              # b2         f32
            pl.BlockSpec((None, D, tn), lambda i: (i, 0, 0)),    # Wp chunk   bf16
            pl.BlockSpec((None, 1, tn), lambda i: (i, 0, 0)),    # bp chunk   f32
        ],
        out_specs=(
            pl.BlockSpec((B_pad, dc), lambda i: (0, i)),         # t_emb chunk
            pl.BlockSpec((B_pad, tn), lambda i: (0, i)),         # proj chunk
        ),
        scratch_shapes=[pltpu.VMEM((B_pad, D), jnp.float32)],
        compiler_params=pltpu.CompilerParams(dimension_semantics=sem),
        cost_estimate=cost,
    )(t_f32, w1_t, b1_r, w2_t, b2_r, wp, bp)

    if B_pad != B:
        t_emb, proj = t_emb[:B], proj[:B]
    return t_emb, proj


# ------------------------------------------------------------------------ references
def _reference_f32(t, w1, b1, w2, b2, proj_ws, proj_bs):
    """Pure f32 math of the PyTorch module (HIGHEST precision)."""
    hp = jax.lax.Precision.HIGHEST
    t2 = t.astype(jnp.float32).reshape(-1, 1)
    h = jnp.dot(t2, w1.T, precision=hp) + b1
    h = h * jax.nn.sigmoid(h)
    t_emb = jnp.dot(h, w2.T, precision=hp) + b2
    g = t_emb * jax.nn.sigmoid(t_emb)
    projs = [jnp.dot(g, w.T, precision=hp) + bb for w, bb in zip(proj_ws, proj_bs)]
    return t_emb, projs


def _reference_bf16_weights(t, w1, b1, w2, b2, proj_ws, proj_bs):
    """Kernel-exact reference: bf16 MXU operands, f32 everything else."""
    hp = jax.lax.Precision.HIGHEST
    bf = lambda x: x.astype(jnp.bfloat16).astype(jnp.float32)
    t2 = t.astype(jnp.float32).reshape(-1, 1)
    h = t2 * w1.reshape(1, -1) + b1
    h = h * jax.nn.sigmoid(h)
    t_emb = jnp.dot(bf(h), bf(w2.T), precision=hp) + b2
    g = t_emb * jax.nn.sigmoid(t_emb)
    projs = [jnp.dot(bf(g), bf(w.T), precision=hp) + bb for w, bb in zip(proj_ws, proj_bs)]
    return t_emb, projs


# ------------------------------------------------------------------------------ demo
if __name__ == "__main__":
    B = 8                    # batch of diffusion timesteps (can be many sampler steps)
    TIME_DIM = 256           # DiffusionUNet default time_dim (lane-dense)
    BASE = 32                # base_channels
    MULTS = (1, 2, 4, 8)     # channel_mults

    # out_channels of every ResidualBlock in DiffusionUNet, in forward order:
    # down (2 per mult) + middle (2) + up (2 per mult, reversed).  Sum = 2432 = 19*128.
    res_out_channels = []
    for m in MULTS:
        res_out_channels += [BASE * m, BASE * m]
    res_out_channels += [BASE * MULTS[-1]] * 2
    for m in reversed(MULTS):
        res_out_channels += [BASE * m, BASE * m]

    key = jax.random.PRNGKey(0)
    key, k_t, k_w1, k_b1, k_w2, k_b2 = jax.random.split(key, 6)
    t = jax.random.uniform(k_t, (B,), jnp.float32) * 1000.0          # diffusion timesteps
    w1 = jax.random.normal(k_w1, (TIME_DIM, 1), jnp.float32) * 0.02
    b1 = jax.random.normal(k_b1, (TIME_DIM,), jnp.float32) * 0.1
    w2 = jax.random.normal(k_w2, (TIME_DIM, TIME_DIM), jnp.float32) * TIME_DIM ** -0.5
    b2 = jax.random.normal(k_b2, (TIME_DIM,), jnp.float32) * 0.1
    proj_ws, proj_bs = [], []
    for c in res_out_channels:
        key, kw, kb = jax.random.split(key, 3)
        proj_ws.append(jax.random.normal(kw, (c, TIME_DIM), jnp.float32) * TIME_DIM ** -0.5)
        proj_bs.append(jax.random.normal(kb, (c,), jnp.float32) * 0.1)

    # One-time layout (would live at model init, not inside the sampling loop).
    n_chunks = pick_n_chunks()           # 1 on v5e/v6e, 2 on v7x
    params, slices = prepare_time_conditioning_params(
        w1, b1, w2, b2, proj_ws, proj_bs, n_chunks=n_chunks)

    t_emb, proj = time_conditioning(t, params)
    t_emb, proj = jax.block_until_ready((t_emb, proj))

    # Kernel-exact reference (same bf16 MXU operands, f32 accumulation) -> tight check.
    t_emb_q, proj_q = _reference_bf16_weights(t, w1, b1, w2, b2, proj_ws, proj_bs)
    # Pure f32 module math -> loose sanity bound on the intentional bf16 approximation.
    t_emb_f, proj_f = _reference_f32(t, w1, b1, w2, b2, proj_ws, proj_bs)

    assert t_emb.shape == (B, TIME_DIM) and t_emb.dtype == jnp.float32
    assert proj.shape[0] == B and proj.shape[1] % 128 == 0
    assert jnp.allclose(t_emb, t_emb_q, atol=5e-2, rtol=5e-3), "t_emb mismatch (bf16 ref)"
    assert jnp.allclose(t_emb, t_emb_f, atol=5e-1, rtol=1e-1), "t_emb mismatch (f32 ref)"
    for (off, size), pq, pf in zip(slices, proj_q, proj_f):
        got = proj[:, off:off + size]
        assert jnp.allclose(got, pq, atol=5e-2, rtol=5e-3), \
            "per-ResBlock time projection mismatch (bf16 ref)"
        assert jnp.allclose(got, pf, atol=5e-1, rtol=1e-1), \
            "per-ResBlock time projection mismatch (f32 ref)"

    print("KERNEL_OK")
</pallas_src>

<mosaic_0001>
module attributes {stable_mosaic.version = 11 : i64} {
  func.func @time_conditioning_kernel(%arg0: i32, %arg1: memref<8xf32, #tpu.memory_space<smem>>, %arg2: memref<1x256xf32, #tpu.memory_space<vmem>>, %arg3: memref<1x256xf32, #tpu.memory_space<vmem>>, %arg4: memref<256x256xbf16, #tpu.memory_space<vmem>>, %arg5: memref<1x256xf32, #tpu.memory_space<vmem>>, %arg6: memref<1x256x2432xbf16, #tpu.memory_space<vmem>>, %arg7: memref<1x1x2432xf32, #tpu.memory_space<vmem>>, %arg8: memref<8x256xf32, #tpu.memory_space<vmem>>, %arg9: memref<8x2432xf32, #tpu.memory_space<vmem>>, %arg10: memref<8x256xf32, #tpu.memory_space<vmem>>) attributes {dimension_semantics = [#tpu.dimension_semantics<arbitrary>], iteration_bounds = array<i64: 1>, scalar_prefetch = 0 : i64, scratch_operands = 1 : i64, tpu.core_type = #tpu.core_type<tc>, window_params = [{transform_indices = @transform_0, window_bounds = array<i64: 8>}, {pipeline_mode = #tpu.pipeline_mode<synchronous>, transform_indices = @transform_1, window_bounds = array<i64: 1, 256>}, {pipeline_mode = #tpu.pipeline_mode<synchronous>, transform_indices = @transform_2, window_bounds = array<i64: 1, 256>}, {pipeline_mode = #tpu.pipeline_mode<synchronous>, transform_indices = @transform_3, window_bounds = array<i64: 256, 256>}, {pipeline_mode = #tpu.pipeline_mode<synchronous>, transform_indices = @transform_4, window_bounds = array<i64: 1, 256>}, {transform_indices = @transform_5, window_bounds = array<i64: 1, 256, 2432>}, {transform_indices = @transform_6, window_bounds = array<i64: 1, 1, 2432>}, {transform_indices = @transform_7, window_bounds = array<i64: 8, 256>}, {transform_indices = @transform_8, window_bounds = array<i64: 8, 2432>}]} {
    %0 = tpu.iota {dimensions = array<i32: 0>} : vector<8x256xi32>
    %cst = arith.constant 0.000000e+00 : f32
    %1 = vector.broadcast %cst : f32 to vector<8x256xf32>
    %c0_i32 = arith.constant 0 : i32
    %2 = vector.broadcast %c0_i32 : i32 to vector<8x256xi32>
    %3 = arith.cmpi eq, %0, %2 : vector<8x256xi32>
    %c0 = arith.constant 0 : index
    %4 = memref.load %arg1[%c0] : memref<8xf32, #tpu.memory_space<smem>>
    %5 = vector.broadcast %4 : f32 to vector<8x256xf32>
    %6 = arith.select %3, %5, %1 : vector<8x256xi1>, vector<8x256xf32>
    %c1_i32 = arith.constant 1 : i32
    %7 = vector.broadcast %c1_i32 : i32 to vector<8x256xi32>
    %8 = arith.cmpi eq, %0, %7 : vector<8x256xi32>
    %c1 = arith.constant 1 : index
    %9 = memref.load %arg1[%c1] : memref<8xf32, #tpu.memory_space<smem>>
    %10 = vector.broadcast %9 : f32 to vector<8x256xf32>
    %11 = arith.select %8, %10, %6 : vector<8x256xi1>, vector<8x256xf32>
    %c2_i32 = arith.constant 2 : i32
    %12 = vector.broadcast %c2_i32 : i32 to vector<8x256xi32>
    %13 = arith.cmpi eq, %0, %12 : vector<8x256xi32>
    %c2 = arith.constant 2 : index
    %14 = memref.load %arg1[%c2] : memref<8xf32, #tpu.memory_space<smem>>
    %15 = vector.broadcast %14 : f32 to vector<8x256xf32>
    %16 = arith.select %13, %15, %11 : vector<8x256xi1>, vector<8x256xf32>
    %c3_i32 = arith.constant 3 : i32
    %17 = vector.broadcast %c3_i32 : i32 to vector<8x256xi32>
    %18 = arith.cmpi eq, %0, %17 : vector<8x256xi32>
    %c3 = arith.constant 3 : index
    %19 = memref.load %arg1[%c3] : memref<8xf32, #tpu.memory_space<smem>>
    %20 = vector.broadcast %19 : f32 to vector<8x256xf32>
    %21 = arith.select %18, %20, %16 : vector<8x256xi1>, vector<8x256xf32>
    %c4_i32 = arith.constant 4 : i32
    %22 = vector.broadcast %c4_i32 : i32 to vector<8x256xi32>
    %23 = arith.cmpi eq, %0, %22 : vector<8x256xi32>
    %c4 = arith.constant 4 : index
    %24 = memref.load %arg1[%c4] : memref<8xf32, #tpu.memory_space<smem>>
    %25 = vector.broadcast %24 : f32 to vector<8x256xf32>
    %26 = arith.select %23, %25, %21 : vector<8x256xi1>, vector<8x256xf32>
    %c5_i32 = arith.constant 5 : i32
    %27 = vector.broadcast %c5_i32 : i32 to vector<8x256xi32>
    %28 = arith.cmpi eq, %0, %27 : vector<8x256xi32>
    %c5 = arith.constant 5 : index
    %29 = memref.load %arg1[%c5] : memref<8xf32, #tpu.memory_space<smem>>
    %30 = vector.broadcast %29 : f32 to vector<8x256xf32>
    %31 = arith.select %28, %30, %26 : vector<8x256xi1>, vector<8x256xf32>
    %c6_i32 = arith.constant 6 : i32
    %32 = vector.broadcast %c6_i32 : i32 to vector<8x256xi32>
    %33 = arith.cmpi eq, %0, %32 : vector<8x256xi32>
    %c6 = arith.constant 6 : index
    %34 = memref.load %arg1[%c6] : memref<8xf32, #tpu.memory_space<smem>>
    %35 = vector.broadcast %34 : f32 to vector<8x256xf32>
    %36 = arith.select %33, %35, %31 : vector<8x256xi1>, vector<8x256xf32>
    %c7_i32 = arith.constant 7 : i32
    %37 = vector.broadcast %c7_i32 : i32 to vector<8x256xi32>
    %38 = arith.cmpi eq, %0, %37 : vector<8x256xi32>
    %c7 = arith.constant 7 : index
    %39 = memref.load %arg1[%c7] : memref<8xf32, #tpu.memory_space<smem>>
    %40 = vector.broadcast %39 : f32 to vector<8x256xf32>
    %41 = arith.select %38, %40, %36 : vector<8x256xi1>, vector<8x256xf32>
    %c0_0 = arith.constant 0 : index
    %c0_1 = arith.constant 0 : index
    %42 = vector.load %arg2[%c0_0, %c0_1] : memref<1x256xf32, #tpu.memory_space<vmem>>, vector<1x256xf32>
    %43 = vector.broadcast %42 : vector<1x256xf32> to vector<8x256xf32>
    %44 = arith.mulf %41, %43 : vector<8x256xf32>
    %c0_2 = arith.constant 0 : index
    %c0_3 = arith.constant 0 : index
    %45 = vector.load %arg3[%c0_2, %c0_3] : memref<1x256xf32, #tpu.memory_space<vmem>>, vector<1x256xf32>
    %46 = vector.broadcast %45 : vector<1x256xf32> to vector<8x256xf32>
    %47 = arith.addf %44, %46 : vector<8x256xf32>
    %48 = arith.negf %47 : vector<8x256xf32>
    %49 = math.exp %48 : vector<8x256xf32>
    %cst_4 = arith.constant 1.000000e+00 : f32
    %50 = vector.broadcast %cst_4 : f32 to vector<8x256xf32>
    %51 = arith.addf %50, %49 : vector<8x256xf32>
    %52 = arith.divf %50, %51 : vector<8x256xf32>
    %53 = arith.mulf %47, %52 : vector<8x256xf32>
    %54 = arith.truncf %53 : vector<8x256xf32> to vector<8x256xbf16>
    %c0_5 = arith.constant 0 : index
    %c0_6 = arith.constant 0 : index
    %55 = vector.load %arg4[%c0_5, %c0_6] : memref<256x256xbf16, #tpu.memory_space<vmem>>, vector<256x256xbf16>
    %cst_7 = arith.constant dense<0.000000e+00> : vector<8x256xf32>
    %56 = tpu.matmul %54, %55, %cst_7 {dimension_numbers = #tpu.dot_dimension_numbers<[1], [0], [0], [1], [0, 0, 1, 1], [], []>} : vector<8x256xbf16>, vector<256x256xbf16>, vector<8x256xf32> -> vector<8x256xf32>
    %c0_8 = arith.constant 0 : index
    %c0_9 = arith.constant 0 : index
    %57 = vector.load %arg5[%c0_8, %c0_9] : memref<1x256xf32, #tpu.memory_space<vmem>>, vector<1x256xf32>
    %58 = vector.broadcast %57 : vector<1x256xf32> to vector<8x256xf32>
    %59 = arith.addf %56, %58 : vector<8x256xf32>
    %c0_10 = arith.constant 0 : index
    %c0_11 = arith.constant 0 : index
    %60 = vector.load %arg8[%c0_10, %c0_11] : memref<8x256xf32, #tpu.memory_space<vmem>>, vector<8x256xf32>
    tpu.vector_store %arg8[%c0_10, %c0_11], %59 {strides = array<i32>} : memref<8x256xf32, #tpu.memory_space<vmem>>, vector<8x256xf32>,
    %61 = arith.negf %59 : vector<8x256xf32>
    %62 = math.exp %61 : vector<8x256xf32>
    %cst_12 = arith.constant 1.000000e+00 : f32
    %63 = vector.broadcast %cst_12 : f32 to vector<8x256xf32>
    %64 = arith.addf %63, %62 : vector<8x256xf32>
    %65 = arith.divf %63, %64 : vector<8x256xf32>
    %66 = arith.mulf %59, %65 : vector<8x256xf32>
    %67 = arith.truncf %66 : vector<8x256xf32> to vector<8x256xbf16>
    %c0_13 = arith.constant 0 : index
    %c0_14 = arith.constant 0 : index
    %c0_15 = arith.constant 0 : index
    %68 = vector.load %arg6[%c0_13, %c0_14, %c0_15] : memref<1x256x2432xbf16, #tpu.memory_space<vmem>>, vector<1x256x2432xbf16>
    %69 = vector.shape_cast %68 : vector<1x256x2432xbf16> to vector<256x2432xbf16>
    %cst_16 = arith.constant dense<0.000000e+00> : vector<8x2432xf32>
    %70 = tpu.matmul %67, %69, %cst_16 {dimension_numbers = #tpu.dot_dimension_numbers<[1], [0], [0], [1], [0, 0, 1, 1], [], []>} : vector<8x256xbf16>, vector<256x2432xbf16>, vector<8x2432xf32> -> vector<8x2432xf32>
    %c0_17 = arith.constant 0 : index
    %c0_18 = arith.constant 0 : index
    %c0_19 = arith.constant 0 : index
    %71 = vector.load %arg7[%c0_17, %c0_18, %c0_19] : memref<1x1x2432xf32, #tpu.memory_space<vmem>>, vector<1x1x2432xf32>
    %72 = vector.shape_cast %71 : vector<1x1x2432xf32> to vector<1x2432xf32>
    %73 = vector.broadcast %72 : vector<1x2432xf32> to vector<8x2432xf32>
    %74 = arith.addf %70, %73 : vector<8x2432xf32>
    %c0_20 = arith.constant 0 : index
    %c0_21 = arith.constant 0 : index
    %75 = vector.load %arg9[%c0_20, %c0_21] : memref<8x2432xf32, #tpu.memory_space<vmem>>, vector<8x2432xf32>
    tpu.vector_store %arg9[%c0_20, %c0_21], %74 {strides = array<i32>} : memref<8x2432xf32, #tpu.memory_space<vmem>>, vector<8x2432xf32>,
    return
  }
  func.func @transform_0(%arg0: i32) -> i32 {
    %c0_i32 = arith.constant 0 : i32
    %c0_i32_0 = arith.constant 0 : i32
    return %c0_i32 : i32
  }
  func.func @transform_1(%arg0: i32) -> (i32, i32) {
    %c0_i32 = arith.constant 0 : i32
    %c0_i32_0 = arith.constant 0 : i32
    %c0_i32_1 = arith.constant 0 : i32
    return %c0_i32, %c0_i32_0 : i32, i32
  }
  func.func @transform_2(%arg0: i32) -> (i32, i32) {
    %c0_i32 = arith.constant 0 : i32
    %c0_i32_0 = arith.constant 0 : i32
    %c0_i32_1 = arith.constant 0 : i32
    return %c0_i32, %c0_i32_0 : i32, i32
  }
  func.func @transform_3(%arg0: i32) -> (i32, i32) {
    %c0_i32 = arith.constant 0 : i32
    %c0_i32_0 = arith.constant 0 : i32
    %c0_i32_1 = arith.constant 0 : i32
    return %c0_i32, %c0_i32_0 : i32, i32
  }
  func.func @transform_4(%arg0: i32) -> (i32, i32) {
    %c0_i32 = arith.constant 0 : i32
    %c0_i32_0 = arith.constant 0 : i32
    %c0_i32_1 = arith.constant 0 : i32
    return %c0_i32, %c0_i32_0 : i32, i32
  }
  func.func @transform_5(%arg0: i32) -> (i32, i32, i32) {
    %c0_i32 = arith.constant 0 : i32
    %c0_i32_0 = arith.constant 0 : i32
    %c0_i32_1 = arith.constant 0 : i32
    return %arg0, %c0_i32, %c0_i32_0 : i32, i32, i32
  }
  func.func @transform_6(%arg0: i32) -> (i32, i32, i32) {
    %c0_i32 = arith.constant 0 : i32
    %c0_i32_0 = arith.constant 0 : i32
    %c0_i32_1 = arith.constant 0 : i32
    return %arg0, %c0_i32, %c0_i32_0 : i32, i32, i32
  }
  func.func @transform_7(%arg0: i32) -> (i32, i32) {
    %c0_i32 = arith.constant 0 : i32
    %c0_i32_0 = arith.constant 0 : i32
    return %c0_i32, %arg0 : i32, i32
  }
  func.func @transform_8(%arg0: i32) -> (i32, i32) {
    %c0_i32 = arith.constant 0 : i32
    %c0_i32_0 = arith.constant 0 : i32
    return %c0_i32, %arg0 : i32, i32
  }
}

</mosaic_0001>

<bundles_post_ra>
// kernel: tpu_custom_call.1
= control target key start
LH: loop header
LB: loop body
LE: loop exit
PB: predicated region body
PF: predicated region fallthrough
CT: control target
= control target key end

     0   :  { %14 = vsyncpa [#allocation6], 0  ;;  %s4121_s0 = inlined_call_operand.hbm [shape: f32[8], index: 0, kind: input, shape index: {}]   ;;  %s4122_s1 = inlined_call_operand.hbm [shape: f32[1,256], index: 1, kind: input, shape index: {}]   ;;  %s4123_s2 = inlined_call_operand.hbm [shape: f32[1,256], index: 2, kind: input, shape index: {}]   ;;  %s4124_s3 = inlined_call_operand.hbm [shape: bf16[256,256], index: 3, kind: input, shape index: {}]   ;;  %s4125_s4 = inlined_call_operand.hbm [shape: f32[1,256], index: 4, kind: input, shape index: {}]   ;;  %s4126_s5 = inlined_call_operand.hbm [shape: bf16[1,256,2432], index: 5, kind: input, shape index: {}]   ;;  %s4127_s6 = inlined_call_operand.hbm [shape: f32[1,1,2432], index: 6, kind: input, shape index: {}]   ;;  %s4128_s7 = inlined_call_operand.hbm [shape: f32[8,256], index: 7, kind: output, shape index: {0}]   ;;  %s4129_s8 = inlined_call_operand.hbm [shape: f32[8,2432], index: 8, kind: output, shape index: {1}]  }
   0x1   :  { %15 = vsyncpa [#allocation4], 0 }
   0x2   :  { %16 = vsyncpa [#allocation9], 0 }
   0x3   :  { %17 = vsyncpa [#allocation12], 0 }
   0x4   :  { %18 = vsyncpa [#allocation15], 0 }
   0x5   :  { %19 = vsyncpa [#allocation5], 0 }
   0x6   :  { %20 = vsyncpa [#allocation18], 0  ;;  %s3951_s27 = smov [#allocation8]   ;;  %s3952_s29 = smov [#allocation11]  }
   0x7   :  { %s45_s28 = sshll.u32 %s3951_s27, 4  ;;  %s67_s30 = sshll.u32 %s3952_s29, 4  ;;  %s46_s28 = int_to_ptr.vmem [resolvable:$true] %s45_s28  ;;  %s68_s30 = int_to_ptr.vmem [resolvable:$true] %s67_s30 }
   0x8   :  { %s3777_s9 = scalar_lea.vmem %s46_s28, 32  ;;  %p3782_p1 = scmp.lt.s32.totalorder %s46_s28, %s46_s28 }
   0x9   :  { %p3778_p0 = scmp.ne.s32.totalorder %s46_s28, %s3777_s9  ;;  %p3783_p2 = scmp.lt.s32.totalorder %s3777_s9, %s3777_s9 }
   0xb   :  { %p3784_p3 = por %p3783_p2, %p3782_p1 }
   0xd   :  { %p3785_p4 = pnand %p3784_p3, %p3778_p0 }
   0xf   :  { %3788 = shalt.err (!%p3785_p4)
}
  0x10   :  { %48 = dma.hbm_to_vmem [thread:$0]  %s4123_s2, 32, %s46_s28, [#allocation9]  }
  0x11   :  { %s3797_s12 = scalar_lea.vmem %s68_s30, 32  ;;  %p3802_p6 = scmp.lt.s32.totalorder %s68_s30, %s68_s30 }
  0x12   :  { %p3798_p5 = scmp.ne.s32.totalorder %s68_s30, %s3797_s12  ;;  %p3803_p7 = scmp.lt.s32.totalorder %s3797_s12, %s3797_s12 }
  0x14   :  { %p3804_p8 = por %p3803_p7, %p3802_p6 }
  0x16   :  { %p3805_p9 = pnand %p3804_p8, %p3798_p5 }
  0x18   :  { %3808 = shalt.err (!%p3805_p9)
}
  0x19   :  { %70 = dma.hbm_to_vmem [thread:$0]  %s4125_s4, 32, %s68_s30, [#allocation12]  }
  0x1a   :  { %s3953_s15 = smov [#allocation3]   ;;  %s3954_s18 = smov [#allocation7]  }
  0x1b   :  { %28 = dma.hbm_to_smem %s4121_s0, 16, %s3953_s15, [#allocation6]  }
  0x1c   :  { %s35_s19 = sshll.u32 %s3954_s18, 4  ;;  %s3955_s2 = smov [#allocation10]   ;;  %s36_s19 = int_to_ptr.vmem [resolvable:$true] %s35_s19 }
  0x1d   :  { %s54_s20 = sshll.u32 %s3955_s2, 4  ;;  %s3825_s21 = scalar_lea.vmem %s36_s19, 32  ;;  %s55_s20 = int_to_ptr.vmem [resolvable:$true] %s54_s20 }
  0x1e   :  { %p3826_p10 = scmp.ne.s32.totalorder %s36_s19, %s3825_s21  ;;  %p3830_p11 = scmp.lt.s32.totalorder %s36_s19, %s36_s19 }
  0x1f   :  { %p3831_p12 = scmp.lt.s32.totalorder %s3825_s21, %s3825_s21 }
  0x21   :  { %p3832_p13 = por %p3831_p12, %p3830_p11 }
  0x23   :  { %p3833_p0 = pnand %p3832_p13, %p3826_p10 }
  0x25   :  { %3836 = shalt.err (!%p3833_p0)
}
  0x26   :  { %38 = dma.hbm_to_vmem [thread:$0]  %s4122_s1, 32, %s36_s19, [#allocation4]  }
  0x27   :  { %s3845_s4 = scalar_lea.vmem %s55_s20, 4096  ;;  %p3850_p2 = scmp.lt.s32.totalorder %s55_s20, %s55_s20 }
  0x28   :  { %p3846_p1 = scmp.ne.s32.totalorder %s55_s20, %s3845_s4  ;;  %p3851_p3 = scmp.lt.s32.totalorder %s3845_s4, %s3845_s4 }
  0x2a   :  { %p3852_p4 = por %p3851_p3, %p3850_p2 }
  0x2c   :  { %p3853_p5 = pnand %p3852_p4, %p3846_p1 }
  0x2e   :  { %3856 = shalt.err (!%p3853_p5)
}
  0x2f   :  { %s3956_s0 = smov 128   ;;  %s3957_s24 = smov 8  }
  0x30   :  { %60 = dma.hbm_to_vmem [thread:$0]  %s4124_s3, 4096, %s55_s20, [#allocation9], %s3956_s0, %s3956_s0, %s3957_s24  }
  0x31   :  { %s3958_s27 = smov [#allocation13]  }
  0x32   :  { %s76_s28 = sshll.u32 %s3958_s27, 4  ;;  %s77_s28 = int_to_ptr.vmem [resolvable:$true] %s76_s28 }
  0x33   :  { %s3865_s29 = scalar_lea.vmem %s77_s28, 38912  ;;  %p3870_p7 = scmp.lt.s32.totalorder %s77_s28, %s77_s28 }
  0x34   :  { %p3866_p6 = scmp.ne.s32.totalorder %s77_s28, %s3865_s29  ;;  %p3871_p8 = scmp.lt.s32.totalorder %s3865_s29, %s3865_s29 }
  0x36   :  { %p3872_p9 = por %p3871_p8, %p3870_p7 }
  0x38   :  { %p3873_p10 = pnand %p3872_p9, %p3866_p6 }
  0x3a   :  { %3876 = shalt.err (!%p3873_p10)
}
  0x3b   :  { %s3959_s1 = smov 1216   ;;  %s3960_s30 = smov 76  }
  0x3c   :  { %82 = dma.hbm_to_vmem [thread:$0]  %s4126_s5, 38912, %s77_s28, [#allocation12], %s3959_s1, %s3959_s1, %s3960_s30  }
  0x3d   :  { %s3961_s11 = smov [#allocation14]  }
  0x3e   :  { %s89_s12 = sshll.u32 %s3961_s11, 4  ;;  %s90_s12 = int_to_ptr.vmem [resolvable:$true] %s89_s12 }
  0x3f   :  { %s3885_s3 = scalar_lea.vmem %s90_s12, 304  ;;  %s3889_s13 = scalar_lea.vmem %s90_s12, 320 }
  0x40   :  { %p3886_p11 = scmp.ne.s32.totalorder %s90_s12, %s3885_s3  ;;  %p3890_p12 = scmp.lt.s32.totalorder %s90_s12, %s90_s12 }
  0x41   :  { %p3891_p13 = scmp.lt.s32.totalorder %s3889_s13, %s3885_s3 }
  0x43   :  { %p3892_p0 = por %p3891_p13, %p3890_p12 }
  0x45   :  { %p3893_p1 = pnand %p3892_p0, %p3886_p11 }
  0x47   :  { %3896 = shalt.err (!%p3893_p1)
}
  0x48   :  { %92 = dma.hbm_to_vmem [thread:$0]  %s4127_s6, 304, %s90_s12, [#allocation15]  }
  0x49   :  { %3937 = dma.done.wait [#allocation6], 16  }
  0x4a   :  { %3938 = vsyncadd [#allocation6], 4294967280 }
  0x4b   :  { %3939 = dma.done.wait [#allocation4], 32  }
  0x4c   :  { %3940 = vsyncadd [#allocation4], 4294967264 }
  0x4d   :  { %3941 = dma.done.wait [#allocation9], 4128  }
  0x4e   :  { %3942 = vsyncadd [#allocation9], 4294963168 }
  0x4f   :  { %3943 = dma.done.wait [#allocation12], 38944  }
  0x50   :  { %3944 = vsyncadd [#allocation12], 4294928352 }
  0x51   :  { %3945 = dma.done.wait [#allocation15], 304  }
  0x52   :  { %3946 = vsyncadd [#allocation15], 4294966992 }
  0x53   :  { %114 = sfence }
  0x54   :  { %v3257_v0 = vld [vmem:[#allocation10 + $0x74] ss:$8 sps:$4 sm:$0xff]   ;;  %v116_v1 = vlaneseq  ;;  %s119_s5 = sld [smem:[#allocation3]]  ;;  %v3259_v2 = vld [vmem:[#allocation10 + $0x70] ss:$8 sps:$4 sm:$0xff]   ;;  %s3962_s21 = smov [#allocation16]  }
  0x55   :  { %s2875_s16 = sld [smem:[#allocation3 + $0x1]]  ;;  %398 = vmatprep.subr.bf16.mxu0 %v3257_v0  ;;  %v3260_v3 = vld [vmem:[#allocation10 + $0x64] ss:$8 sps:$4 sm:$0xff]   ;;  %v3262_v5 = vld [vmem:[#allocation10 + $0x60] ss:$8 sps:$4 sm:$0xff]   ;;  %s2848_s22 = sshll.u32 %s3962_s21, 4  ;;  %s2849_s22 = int_to_ptr.vmem [resolvable:$true] %s2848_s22 }
  0x56   :  { %v4030_v4 = vshrl.u32 %v116_v1, 7  ;;  %399 = vmatpush1.bf16.msra.mxu0 %v3259_v2  ;;  %v3263_v6 = vld [vmem:[#allocation10 + $0x54] ss:$8 sps:$4 sm:$0xff]   ;;  %v3265_v8 = vld [vmem:[#allocation10 + $0x50] ss:$8 sps:$4 sm:$0xff]   ;;  %s2876_s6 = sld [smem:[#allocation3 + $0x2]]  ;;  %p3902_p3 = scmp.lt.s32.totalorder %s2849_s22, %s2849_s22 }
  0x57   :  { %400 = vmatprep.subr.bf16.mxu0 %v3260_v3  ;;  %v3266_v9 = vld [vmem:[#allocation10 + $0x44] ss:$8 sps:$4 sm:$0xff]   ;;  %s2877_s17 = sld [smem:[#allocation3 + $0x3]]  ;;  %v3268_v12 = vld [vmem:[#allocation10 + $0x40] ss:$8 sps:$4 sm:$0xff]   ;;  %s3897_s23 = scalar_lea.vmem %s2849_s22, 256 }
  0x58   :  { %vm118_vm0 = vcmp.eq.s32.totalorder %v4030_v4, 0  ;;  %vm122_vm1 = vcmp.eq.s32.totalorder %v4030_v4, 1  ;;  %vm126_vm2 = vcmp.eq.s32.totalorder %v4030_v4, 2  ;;  %v3269_v13 = vld [vmem:[#allocation10 + $0x34] ss:$8 sps:$4 sm:$0xff]   ;;  %s2878_s18 = sld [smem:[#allocation3 + $0x4]]  ;;  %p3898_p2 = scmp.ne.s32.totalorder %s2849_s22, %s3897_s23 }
  0x59   :  { %vm130_vm3 = vcmp.eq.s32.totalorder %v4030_v4, 3  ;;  %s2879_s19 = sld [smem:[#allocation3 + $0x5]]  ;;  %v3271_v16 = vld [vmem:[#allocation10 + $0x30] ss:$8 sps:$4 sm:$0xff]   ;;  %vm134_vm4 = vcmp.eq.s32.totalorder %v4030_v4, 4  ;;  %vm138_vm5 = vcmp.eq.s32.totalorder %v4030_v4, 5  ;;  %p3903_p4 = scmp.lt.s32.totalorder %s3897_s23, %s3897_s23 }
  0x5a   :  { %v120_v7 = vstv %s119_s5  ;;  %401 = vmatpush1.bf16.msra.mxu0 %v3262_v5  ;;  %v3272_v19 = vld [vmem:[#allocation10 + $0x24] ss:$8 sps:$4 sm:$0xff]   ;;  %s2880_s2 = sld [smem:[#allocation3 + $0x6]]  ;;  %v4039_v22 = vsub.s32 0, %v4030_v4  ;;  %v4042_v23 = vsub.s32 1, %v4030_v4  ;;  %vm142_vm6 = vcmp.eq.s32.totalorder %v4030_v4, 6 }
  0x5b   :  { %402 = vmatprep.subr.bf16.mxu0 %v3263_v6  ;;  %v121_v10 = vsel %vm118_vm0, %v120_v7, 0.0  ;;  %v124_v11 = vstv %s2875_s16  ;;  %s2881_s20 = sld [smem:[#allocation3 + $0x7]]  ;;  %v3274_v24 = vld [vmem:[#allocation10 + $0x20] ss:$8 sps:$4 sm:$0xff]   ;;  %v3275_v27 = vld [vmem:[#allocation10 + $0x14] ss:$8 sps:$4 sm:$0xff]   ;;  %p3904_p5 = por %p3903_p4, %p3902_p3 }
  0x5c   :  { %v125_v14 = vsel %vm122_vm1, %v124_v11, %v121_v10  ;;  %v128_v15 = vstv %s2876_s6  ;;  %vm146_vm7 = vcmp.eq.s32.totalorder %v4030_v4, 7  ;;  %v150_v29 = vld [vmem:[#allocation7] sm:$0x3]  ;;  %v164_v30 = vld [vmem:[#allocation8] sm:$0x3] }
  0x5d   :  { %v129_v17 = vsel %vm126_vm2, %v128_v15, %v125_v14  ;;  %v132_v18 = vstv %s2877_s17  ;;  %v155_v32 = vrot.slane %v150_v29, %v4039_v22  ;;  %v159_v33 = vrot.slane %v150_v29, %v4042_v23  ;;  %v3305_v34 = vld [vmem:[#allocation13 + $0x42c] ss:$76 sps:$4 sm:$0xff]   ;;  %v3310_v42 = vld [vmem:[#allocation13 + $0x428] ss:$76 sps:$4 sm:$0xff]   ;;  %v3316_v50 = vld [vmem:[#allocation13 + $0x390] ss:$76 sps:$4 sm:$0xff]   ;;  %p3905_p6 = pnand %p3904_p5, %p3898_p2 }
  0x5e   :  { %403 = vmatpush1.bf16.msra.mxu0 %v3265_v8  ;;  %v133_v20 = vsel %vm130_vm3, %v132_v18, %v129_v17  ;;  %v136_v21 = vstv %s2878_s18  ;;  %v3277_v35 = vld [vmem:[#allocation10 + $0x10] ss:$8 sps:$4 sm:$0xff]   ;;  %v169_v38 = vrot.slane %v164_v30, %v4039_v22  ;;  %v173_v39 = vrot.slane %v164_v30, %v4042_v23  ;;  %v3278_v40 = vld [vmem:[#allocation10 + $0x4] ss:$8 sps:$4 sm:$0xff]   ;;  %2414 = vmatprep.subr.bf16.mxu1 %v3305_v34  ;;  %v3280_v46 = vld [vmem:[#allocation10] ss:$8 sps:$4 sm:$0xff]  }
  0x5f   :  { %404 = vmatprep.subr.bf16.mxu0 %v3266_v9  ;;  %v137_v25 = vsel %vm134_vm4, %v136_v21, %v133_v20  ;;  %v140_v26 = vstv %s2879_s19  ;;  %v3311_v45 = vld [vmem:[#allocation13 + $0x394] ss:$76 sps:$4 sm:$0xff]   ;;  %2415 = vmatpush1.bf16.msra.mxu1 %v3310_v42  ;;  %v3317_v51 = vld [vmem:[#allocation13 + $0x2fc] ss:$76 sps:$4 sm:$0xff]   ;;  %v3322_v55 = vld [vmem:[#allocation13 + $0x2f8] ss:$76 sps:$4 sm:$0xff]  }
  0x60   :  { %v141_v28 = vsel %vm138_vm5, %v140_v26, %v137_v25  ;;  %v144_v31 = vstv %s2880_s2  ;;  %v3281_v47 = vld [vmem:[#allocation10 + $0xf4] ss:$8 sps:$4 sm:$0xff]   ;;  %2416 = vmatprep.subr.bf16.mxu1 %v3311_v45  ;;  %v3283_v54 = vld [vmem:[#allocation10 + $0xf0] ss:$8 sps:$4 sm:$0xff]   ;;  %v3284_v57 = vld [vmem:[#allocation10 + $0xe4] ss:$8 sps:$4 sm:$0xff]  }
  0x61   :  { %v145_v36 = vsel %vm142_vm6, %v144_v31, %v141_v28  ;;  %v148_v37 = vstv %s2881_s20  ;;  %v3323_v56 = vld [vmem:[#allocation13 + $0x264] ss:$76 sps:$4 sm:$0xff]   ;;  %v3328_v58 = vld [vmem:[#allocation13 + $0x260] ss:$76 sps:$4 sm:$0xff]   ;;  %v3334_v0 = vld [vmem:[#allocation13 + $0x1c8] ss:$76 sps:$4 sm:$0xff]  }
  0x62   :  { %405 = vmatpush1.bf16.msra.mxu0 %v3268_v12  ;;  %v149_v41 = vsel %vm146_vm7, %v148_v37, %v145_v36  ;;  %v3286_v59 = vld [vmem:[#allocation10 + $0xe0] ss:$8 sps:$4 sm:$0xff]   ;;  %v3329_v60 = vld [vmem:[#allocation13 + $0x1cc] ss:$76 sps:$4 sm:$0xff]  }
  0x63   :  { %406 = vmatprep.subr.bf16.mxu0 %v3269_v13  ;;  %v162_v43 = vmul.f32 %v155_v32, %v149_v41  ;;  %v163_v44 = vmul.f32 %v159_v33, %v149_v41  ;;  %2417 = vmatpush1.bf16.msra.mxu1 %v3316_v50  ;;  %v3287_v61 = vld [vmem:[#allocation10 + $0xd4] ss:$8 sps:$4 sm:$0xff]   ;;  %v3289_v62 = vld [vmem:[#allocation10 + $0xd0] ss:$8 sps:$4 sm:$0xff]   ;;  %v3290_v63 = vld [vmem:[#allocation10 + $0xc4] ss:$8 sps:$4 sm:$0xff]  }
  0x64   :  { %2418 = vmatprep.subr.bf16.mxu1 %v3317_v51  ;;  %v3335_v1 = vld [vmem:[#allocation13 + $0x134] ss:$76 sps:$4 sm:$0xff]   ;;  %v3340_v2 = vld [vmem:[#allocation13 + $0x130] ss:$76 sps:$4 sm:$0xff]   ;;  %v3313_v28 = vld [vmem:[#allocation13 + $0x398] ss:$76 sps:$4 sm:$0xff]  }
  0x65   :  { %v4050_v48 = vadd.f32 %v173_v39, %v163_v44  ;;  %v4052_v49 = vadd.f32 %v169_v38, %v162_v43  ;;  %v3292_v3 = vld [vmem:[#allocation10 + $0xc0] ss:$8 sps:$4 sm:$0xff]   ;;  %v3293_v5 = vld [vmem:[#allocation10 + $0xb4] ss:$8 sps:$4 sm:$0xff]   ;;  %v3295_v8 = vld [vmem:[#allocation10 + $0xb0] ss:$8 sps:$4 sm:$0xff]  }
  0x66   :  { %407 = vmatpush1.bf16.msra.mxu0 %v3271_v16  ;;  %v3296_v10 = vld [vmem:[#allocation10 + $0xa4] ss:$8 sps:$4 sm:$0xff]   ;;  %v3298_v12 = vld [vmem:[#allocation10 + $0xa0] ss:$8 sps:$4 sm:$0xff]   ;;  %v3299_v13 = vld [vmem:[#allocation10 + $0x94] ss:$8 sps:$4 sm:$0xff]  }
  0x67   :  { %408 = vmatprep.subr.bf16.mxu0 %v3272_v19  ;;  %v2883_v52 = vmul.f32 -1.442695, %v4050_v48  ;;  %v2882_v53 = vmul.f32 -1.442695, %v4052_v49  ;;  %2419 = vmatpush1.bf16.msra.mxu1 %v3322_v55  ;;  %v3301_v14 = vld [vmem:[#allocation10 + $0x90] ss:$8 sps:$4 sm:$0xff]  }
  0x68   :  { %2420 = vmatprep.subr.bf16.mxu1 %v3323_v56  ;;  %v3302_v15 = vld [vmem:[#allocation10 + $0x84] ss:$8 sps:$4 sm:$0xff]   ;;  %v3304_v16 = vld [vmem:[#allocation10 + $0x80] ss:$8 sps:$4 sm:$0xff]  }
  0x69   :  { %3753 = vpow2.f32 %v2883_v52  ;;  %v3309_v17 = vld [vmem:[#allocation13 + $0x434] ss:$76 sps:$4 sm:$0xff]   ;;  %v3307_v21 = vld [vmem:[#allocation13 + $0x430] ss:$76 sps:$4 sm:$0xff]   ;;  %v3327_v31 = vld [vmem:[#allocation13 + $0x26c] ss:$76 sps:$4 sm:$0xff]  }
  0x6a   :  { %409 = vmatpush1.bf16.msra.mxu0 %v3274_v24  ;;  %3755 = vpow2.f32 %v2882_v53  ;;  %v3315_v25 = vld [vmem:[#allocation13 + $0x39c] ss:$76 sps:$4 sm:$0xff]   ;;  %v3321_v29 = vld [vmem:[#allocation13 + $0x304] ss:$76 sps:$4 sm:$0xff]   ;;  %v3319_v30 = vld [vmem:[#allocation13 + $0x300] ss:$76 sps:$4 sm:$0xff]  }
  0x6b   :  { %410 = vmatprep.subr.bf16.mxu0 %v3275_v27  ;;  %2421 = vmatpush1.bf16.msra.mxu1 %v3328_v58  ;;  %v3325_v32 = vld [vmem:[#allocation13 + $0x268] ss:$76 sps:$4 sm:$0xff]   ;;  %v3331_v34 = vld [vmem:[#allocation13 + $0x1d0] ss:$76 sps:$4 sm:$0xff]   ;;  %v3337_v36 = vld [vmem:[#allocation13 + $0x138] ss:$76 sps:$4 sm:$0xff]  }
  0x6c   :  { %2422 = vmatprep.subr.bf16.mxu1 %v3329_v60  ;;  %v3333_v33 = vld [vmem:[#allocation13 + $0x1d4] ss:$76 sps:$4 sm:$0xff]   ;;  %v3341_v37 = vld [vmem:[#allocation13 + $0x9c] ss:$76 sps:$4 sm:$0xff]   ;;  %v3345_v38 = vld [vmem:[#allocation13 + $0xa4] ss:$76 sps:$4 sm:$0xff]  }
  0x6d   :  { %v3343_v39 = vld [vmem:[#allocation13 + $0xa0] ss:$76 sps:$4 sm:$0xff]   ;;  %v3347_v41 = vld [vmem:[#allocation13 + $0x4] ss:$76 sps:$4 sm:$0xff]   ;;  %v3349_v43 = vld [vmem:[#allocation13 + $0x8] ss:$76 sps:$4 sm:$0xff]  }
  0x6e   :  { %411 = vmatpush1.bf16.msra.mxu0 %v3277_v35  ;;  %v3339_v35 = vld [vmem:[#allocation13 + $0x13c] ss:$76 sps:$4 sm:$0xff]   ;;  %v3351_v42 = vld [vmem:[#allocation13 + $0xc] ss:$76 sps:$4 sm:$0xff]  }
  0x6f   :  { %412 = vmatprep.subr.bf16.mxu0 %v3278_v40  ;;  %2423 = vmatpush1.bf16.msra.mxu1 %v3334_v0  ;;  %v3346_v40 = vld [vmem:[#allocation13 + $0x98] ss:$76 sps:$4 sm:$0xff]   ;;  %v3352_v44 = vld [vmem:[#allocation13] ss:$76 sps:$4 sm:$0xff]   ;;  %v3363_v50 = vld [vmem:[#allocation13 + $0x85c] ss:$76 sps:$4 sm:$0xff]  }
  0x70   :  { %2424 = vmatprep.subr.bf16.mxu1 %v3335_v1  ;;  %v3353_v45 = vld [vmem:[#allocation13 + $0x8ec] ss:$76 sps:$4 sm:$0xff]   ;;  %v3364_v52 = vld [vmem:[#allocation13 + $0x850] ss:$76 sps:$4 sm:$0xff]   ;;  %v3382_v0 = vld [vmem:[#allocation13 + $0x688] ss:$76 sps:$4 sm:$0xff]  }
  0x71   :  { %v3361_v51 = vld [vmem:[#allocation13 + $0x858] ss:$76 sps:$4 sm:$0xff]   ;;  %v3365_v53 = vld [vmem:[#allocation13 + $0x7bc] ss:$76 sps:$4 sm:$0xff]   ;;  %v3367_v55 = vld [vmem:[#allocation13 + $0x7c0] ss:$76 sps:$4 sm:$0xff]  }
  0x72   :  { %413 = vmatpush1.bf16.msra.mxu0 %v3280_v46  ;;  %v3357_v46 = vld [vmem:[#allocation13 + $0x8f4] ss:$76 sps:$4 sm:$0xff]   ;;  %v3370_v56 = vld [vmem:[#allocation13 + $0x7b8] ss:$76 sps:$4 sm:$0xff]  }
  0x73   :  { %414 = vmatprep.subr.bf16.mxu0 %v3281_v47  ;;  %2425 = vmatpush1.bf16.msra.mxu1 %v3340_v2  ;;  %v3355_v47 = vld [vmem:[#allocation13 + $0x8f0] ss:$76 sps:$4 sm:$0xff]   ;;  %v3375_v58 = vld [vmem:[#allocation13 + $0x72c] ss:$76 sps:$4 sm:$0xff]   ;;  %v3383_v1 = vld [vmem:[#allocation13 + $0x5f4] ss:$76 sps:$4 sm:$0xff]  }
  0x74   :  { %2426 = vmatprep.subr.bf16.mxu1 %v3341_v37  ;;  %v3376_v60 = vld [vmem:[#allocation13 + $0x720] ss:$76 sps:$4 sm:$0xff]   ;;  %v3387_v2 = vld [vmem:[#allocation13 + $0x5fc] ss:$76 sps:$4 sm:$0xff]  }
  0x76   :  { %415 = vmatpush2.bf16.msra.mxu0 %v3283_v54  ;;  %v3754_v6 = vpop.eup %3753  ;;  %v3369_v54 = vld [vmem:[#allocation13 + $0x7c4] ss:$76 sps:$4 sm:$0xff]  }
  0x77   :  { %416 = vmatprep.subr.bf16.mxu0 %v3284_v57  ;;  %v3756_v7 = vpop.eup %3755  ;;  %v185_v9 = vadd.f32 1.0, %v3754_v6  ;;  %2427 = vmatpush1.bf16.msra.mxu1 %v3346_v40  ;;  %v3371_v57 = vld [vmem:[#allocation13 + $0x724] ss:$76 sps:$4 sm:$0xff]   ;;  %v3389_v6 = vld [vmem:[#allocation13 + $0x55c] ss:$76 sps:$4 sm:$0xff]  }
  0x78   :  { %v184_v11 = vadd.f32 1.0, %v3756_v7  ;;  %2428 = vmatprep.subr.bf16.mxu1 %v3347_v41  ;;  %v3393_v7 = vld [vmem:[#allocation13 + $0x564] ss:$76 sps:$4 sm:$0xff]  }
  0x79   :  { %3757 = vrcp.f32 %v185_v9  ;;  %v3394_v9 = vld [vmem:[#allocation13 + $0x558] ss:$76 sps:$4 sm:$0xff]  }
  0x7a   :  { %417 = vmatpush2.bf16.msra.mxu0 %v3286_v59  ;;  %3759 = vrcp.f32 %v184_v11  ;;  %v3373_v59 = vld [vmem:[#allocation13 + $0x728] ss:$76 sps:$4 sm:$0xff]   ;;  %v3399_v11 = vld [vmem:[#allocation13 + $0x4cc] ss:$76 sps:$4 sm:$0xff]   ;;  %v3409_v41 = vld [vmem:[#allocation13 + $0x3a4] ss:$76 sps:$4 sm:$0xff]  }
  0x7b   :  { %418 = vmatprep.subr.bf16.mxu0 %v3287_v61  ;;  %2429 = vmatpush1.bf16.msra.mxu1 %v3352_v44  ;;  %v3377_v61 = vld [vmem:[#allocation13 + $0x68c] ss:$76 sps:$4 sm:$0xff]   ;;  %v3410_v44 = vld [vmem:[#allocation13 + $0x3a8] ss:$76 sps:$4 sm:$0xff]  }
  0x7c   :  { %2430 = vmatprep.subr.bf16.mxu1 %v3353_v45  ;;  %v3415_v45 = vld [vmem:[#allocation13 + $0x30c] ss:$76 sps:$4 sm:$0xff]  }
  0x7e   :  { %419 = vmatpush2.bf16.msra.mxu0 %v3289_v62  ;;  %v3381_v62 = vld [vmem:[#allocation13 + $0x694] ss:$76 sps:$4 sm:$0xff]  }
  0x7f   :  { %420 = vmatprep.subr.bf16.mxu0 %v3290_v63  ;;  %v3379_v63 = vld [vmem:[#allocation13 + $0x690] ss:$76 sps:$4 sm:$0xff]  }
  0x82   :  { %421 = vmatpush2.bf16.msra.mxu0 %v3292_v3  ;;  %v3385_v3 = vld [vmem:[#allocation13 + $0x5f8] ss:$76 sps:$4 sm:$0xff]  }
  0x83   :  { %422 = vmatprep.subr.bf16.mxu0 %v3293_v5  ;;  %v3388_v5 = vld [vmem:[#allocation13 + $0x5f0] ss:$76 sps:$4 sm:$0xff]  }
  0x86   :  { %423 = vmatpush2.bf16.msra.mxu0 %v3295_v8  ;;  %v3758_v18 = vpop.eup %3757  ;;  %v3391_v8 = vld [vmem:[#allocation13 + $0x560] ss:$76 sps:$4 sm:$0xff]  }
  0x87   :  { %424 = vmatprep.subr.bf16.mxu0 %v3296_v10  ;;  %v3760_v19 = vpop.eup %3759  ;;  %v191_v20 = vmul.f32 %v3758_v18, %v4050_v48  ;;  %v3358_v48 = vld [vmem:[#allocation13 + $0x8e8] ss:$76 sps:$4 sm:$0xff]   ;;  %v3395_v10 = vld [vmem:[#allocation13 + $0x4c4] ss:$76 sps:$4 sm:$0xff]  }
  0x88   :  { %v190_v24 = vmul.f32 %v3760_v19, %v4052_v49  ;;  %2431 = vmatpush2.bf16.msra.mxu1 %v3358_v48  ;;  %v3359_v49 = vld [vmem:[#allocation13 + $0x854] ss:$76 sps:$4 sm:$0xff]   ;;  %v3416_v48 = vld [vmem:[#allocation13 + $0x310] ss:$76 sps:$4 sm:$0xff]  }
  0x89   :  { %v193_v26 = vpack.c.bf16 %v191_v20, %v191_v20  ;;  %2432 = vmatprep.subr.bf16.mxu1 %v3359_v49  ;;  %v3421_v49 = vld [vmem:[#allocation13 + $0x274] ss:$76 sps:$4 sm:$0xff]  }
  0x8a   :  { %425 = vmatpush2.bf16.msra.mxu0 %v3298_v12  ;;  %v192_v27 = vpack.c.bf16 %v190_v24, %v190_v24  ;;  %v3397_v12 = vld [vmem:[#allocation13 + $0x4c8] ss:$76 sps:$4 sm:$0xff]  }
  0x8b   :  { %426 = vmatprep.subr.bf16.mxu0 %v3299_v13  ;;  %430 = vmatprep.mubr.bf16.mxu0 %v193_v26  ;;  %v3400_v13 = vld [vmem:[#allocation13 + $0x4c0] ss:$76 sps:$4 sm:$0xff]  }
  0x8c   :  { %2433 = vmatpush2.bf16.msra.mxu1 %v3364_v52  ;;  %v3422_v52 = vld [vmem:[#allocation13 + $0x278] ss:$76 sps:$4 sm:$0xff]  }
  0x8d   :  { %2434 = vmatprep.subr.bf16.mxu1 %v3365_v53  ;;  %v3427_v53 = vld [vmem:[#allocation13 + $0x1dc] ss:$76 sps:$4 sm:$0xff]  }
  0x8e   :  { %427 = vmatpush2.bf16.msra.mxu0 %v3301_v14  ;;  %v3403_v14 = vld [vmem:[#allocation13 + $0x43c] ss:$76 sps:$4 sm:$0xff]  }
  0x8f   :  { %428 = vmatprep.subr.bf16.mxu0 %v3302_v15  ;;  %v3406_v15 = vld [vmem:[#allocation13 + $0x444] ss:$76 sps:$4 sm:$0xff]  }
  0x90   :  { %2435 = vmatpush2.bf16.msra.mxu1 %v3370_v56  ;;  %v3428_v56 = vld [vmem:[#allocation13 + $0x1e0] ss:$76 sps:$4 sm:$0xff]  }
  0x91   :  { %2436 = vmatprep.subr.bf16.mxu1 %v3371_v57  ;;  %v3433_v57 = vld [vmem:[#allocation13 + $0x144] ss:$76 sps:$4 sm:$0xff]  }
  0x92   :  { %429 = vmatpush2.bf16.msra.mxu0 %v3304_v16  ;;  %v226_v16 = vld [vmem:[#allocation11] sm:$0x3] }
  0x93   :  { %2455 = vmatprep.subr.bf16.mxu0 %v3309_v17  ;;  %v231_v17 = vrot.slane %v226_v16, %v4039_v22  ;;  %v235_v18 = vrot.slane %v226_v16, %v4042_v23  ;;  %v3461_v16 = vld [vmem:[#allocation13 + $0x7c8] ss:$76 sps:$4 sm:$0xff]  }
  0x94   :  { %2437 = vmatpush2.bf16.msra.mxu1 %v3376_v60  ;;  %v3434_v60 = vld [vmem:[#allocation13 + $0x148] ss:$76 sps:$4 sm:$0xff]  }
  0x95   :  { %431 = vmatmul.mubr.bf16.vlgmr.msra.gmra.mxu0 %v192_v27  ;;  %2438 = vmatprep.subr.bf16.mxu1 %v3377_v61  ;;  %v3439_v61 = vld [vmem:[#allocation13 + $0xac] ss:$76 sps:$4 sm:$0xff]  }
  0x96   :  { %2456 = vmatpush1.bf16.msra.mxu0 %v3307_v21 }
  0x97   :  { %2457 = vmatprep.subr.bf16.mxu0 %v3315_v25 }
  0x98   :  { %2439 = vmatpush2.bf16.msra.mxu1 %v3382_v0  ;;  %v3440_v0 = vld [vmem:[#allocation13 + $0xb0] ss:$76 sps:$4 sm:$0xff]  }
  0x99   :  { %2440 = vmatprep.subr.bf16.mxu1 %v3383_v1  ;;  %v3445_v1 = vld [vmem:[#allocation13 + $0x14] ss:$76 sps:$4 sm:$0xff]  }
  0x9a   :  { %2458 = vmatpush1.bf16.msra.mxu0 %v3313_v28 }
  0x9b   :  { %2459 = vmatprep.subr.bf16.mxu0 %v3321_v29 }
  0x9c   :  { %2441 = vmatpush2.bf16.msra.mxu1 %v3388_v5  ;;  %v3446_v5 = vld [vmem:[#allocation13 + $0x18] ss:$76 sps:$4 sm:$0xff]  }
  0x9d   :  { %2442 = vmatprep.subr.bf16.mxu1 %v3389_v6  ;;  %v3451_v6 = vld [vmem:[#allocation13 + $0x8fc] ss:$76 sps:$4 sm:$0xff]  }
  0x9e   :  { %2460 = vmatpush1.bf16.msra.mxu0 %v3319_v30 }
  0x9f   :  { %2461 = vmatprep.subr.bf16.mxu0 %v3327_v31 }
  0xa0   :  { %2443 = vmatpush2.bf16.msra.mxu1 %v3394_v9  ;;  %v3452_v9 = vld [vmem:[#allocation13 + $0x900] ss:$76 sps:$4 sm:$0xff]  }
  0xa1   :  { %2444 = vmatprep.subr.bf16.mxu1 %v3395_v10  ;;  %v3457_v10 = vld [vmem:[#allocation13 + $0x864] ss:$76 sps:$4 sm:$0xff]  }
  0xa2   :  { %2462 = vmatpush1.bf16.msra.mxu0 %v3325_v32 }
  0xa3   :  { %2463 = vmatprep.subr.bf16.mxu0 %v3333_v33 }
  0xa4   :  { %2445 = vmatpush2.bf16.msra.mxu1 %v3400_v13  ;;  %v3458_v13 = vld [vmem:[#allocation13 + $0x868] ss:$76 sps:$4 sm:$0xff]  }
  0xa5   :  { %2496 = vmatprep.subr.bf16.mxu1 %v3403_v14  ;;  %v3463_v14 = vld [vmem:[#allocation13 + $0x7cc] ss:$76 sps:$4 sm:$0xff]  }
  0xa6   :  { %2464 = vmatpush1.bf16.msra.mxu0 %v3331_v34 }
  0xa7   :  { %2465 = vmatprep.subr.bf16.mxu0 %v3339_v35 }
  0xaa   :  { %2466 = vmatpush1.bf16.msra.mxu0 %v3337_v36 }
  0xab   :  { %2467 = vmatprep.subr.bf16.mxu0 %v3345_v38  ;;  %v3401_v38 = vld [vmem:[#allocation13 + $0x438] ss:$76 sps:$4 sm:$0xff]  }
  0xae   :  { %2468 = vmatpush1.bf16.msra.mxu0 %v3343_v39  ;;  %v3404_v39 = vld [vmem:[#allocation13 + $0x440] ss:$76 sps:$4 sm:$0xff]  }
  0xaf   :  { %2469 = vmatprep.subr.bf16.mxu0 %v3351_v42  ;;  %v3412_v42 = vld [vmem:[#allocation13 + $0x3ac] ss:$76 sps:$4 sm:$0xff]  }
  0xb2   :  { %2470 = vmatpush1.bf16.msra.mxu0 %v3349_v43  ;;  %v3407_v43 = vld [vmem:[#allocation13 + $0x3a0] ss:$76 sps:$4 sm:$0xff]  }
  0xb3   :  { %2471 = vmatprep.subr.bf16.mxu0 %v3357_v46  ;;  %v3418_v46 = vld [vmem:[#allocation13 + $0x314] ss:$76 sps:$4 sm:$0xff]  }
  0xb6   :  { %2472 = vmatpush2.bf16.msra.mxu0 %v3355_v47  ;;  %v3413_v47 = vld [vmem:[#allocation13 + $0x308] ss:$76 sps:$4 sm:$0xff]  }
  0xb7   :  { %2473 = vmatprep.subr.bf16.mxu0 %v3363_v50  ;;  %v3424_v50 = vld [vmem:[#allocation13 + $0x27c] ss:$76 sps:$4 sm:$0xff]  }
  0xba   :  { %2474 = vmatpush2.bf16.msra.mxu0 %v3361_v51  ;;  %v3419_v51 = vld [vmem:[#allocation13 + $0x270] ss:$76 sps:$4 sm:$0xff]  }
  0xbb   :  { %2475 = vmatprep.subr.bf16.mxu0 %v3369_v54  ;;  %v3430_v54 = vld [vmem:[#allocation13 + $0x1e4] ss:$76 sps:$4 sm:$0xff]  }
  0xbe   :  { %2476 = vmatpush2.bf16.msra.mxu0 %v3367_v55  ;;  %v3425_v55 = vld [vmem:[#allocation13 + $0x1d8] ss:$76 sps:$4 sm:$0xff]  }
  0xbf   :  { %2477 = vmatprep.subr.bf16.mxu0 %v3375_v58  ;;  %v3436_v58 = vld [vmem:[#allocation13 + $0x14c] ss:$76 sps:$4 sm:$0xff]  }
  0xc2   :  { %2478 = vmatpush2.bf16.msra.mxu0 %v3373_v59  ;;  %v3431_v59 = vld [vmem:[#allocation13 + $0x140] ss:$76 sps:$4 sm:$0xff]  }
  0xc3   :  { %2479 = vmatprep.subr.bf16.mxu0 %v3381_v62  ;;  %v3442_v62 = vld [vmem:[#allocation13 + $0xb4] ss:$76 sps:$4 sm:$0xff]  }
  0xc6   :  { %2480 = vmatpush2.bf16.msra.mxu0 %v3379_v63  ;;  %v3437_v63 = vld [vmem:[#allocation13 + $0xa8] ss:$76 sps:$4 sm:$0xff]  }
  0xc7   :  { %2481 = vmatprep.subr.bf16.mxu0 %v3387_v2  ;;  %v3448_v2 = vld [vmem:[#allocation13 + $0x1c] ss:$76 sps:$4 sm:$0xff]  }
  0xca   :  { %2482 = vmatpush2.bf16.msra.mxu0 %v3385_v3  ;;  %v3443_v3 = vld [vmem:[#allocation13 + $0x10] ss:$76 sps:$4 sm:$0xff]  }
  0xcb   :  { %2483 = vmatprep.subr.bf16.mxu0 %v3393_v7  ;;  %v3454_v7 = vld [vmem:[#allocation13 + $0x904] ss:$76 sps:$4 sm:$0xff]  }
  0xce   :  { %2484 = vmatpush2.bf16.msra.mxu0 %v3391_v8  ;;  %v3449_v8 = vld [vmem:[#allocation13 + $0x8f8] ss:$76 sps:$4 sm:$0xff]  }
  0xcf   :  { %2485 = vmatprep.subr.bf16.mxu0 %v3399_v11  ;;  %v3460_v11 = vld [vmem:[#allocation13 + $0x86c] ss:$76 sps:$4 sm:$0xff]  }
  0xd2   :  { %2486 = vmatpush2.bf16.msra.mxu0 %v3397_v12  ;;  %v3455_v12 = vld [vmem:[#allocation13 + $0x860] ss:$76 sps:$4 sm:$0xff]  }
  0xd3   :  { %2537 = vmatprep.subr.bf16.mxu0 %v3406_v15  ;;  %v3466_v15 = vld [vmem:[#allocation13 + $0x7d4] ss:$76 sps:$4 sm:$0xff]  }
 0x155   :  { %v432_v19 = vpop.f32.mrf.mxu0 }
 0x156   :  { %v433_v20 = vadd.f32 %v432_v19, %v231_v17  ;;  %v3464_v17 = vld [vmem:[#allocation13 + $0x7d0] ss:$76 sps:$4 sm:$0xff]  }
 0x157   :  { %v434_v21 = vpop.f32.mrf.mxu0  ;;  %v3472_v19 = vld [vmem:[#allocation13 + $0x73c] ss:$76 sps:$4 sm:$0xff]  }
 0x158   :  { %v2916_v24 = vmul.f32 -1.442695, %v433_v20  ;;  %439 = vst [vmem:[#allocation16] sm:$0xff] %v433_v20  ;;  %v435_v25 = vadd.f32 %v434_v21, %v235_v18  ;;  %v3469_v18 = vld [vmem:[#allocation13 + $0x734] ss:$76 sps:$4 sm:$0xff]  }
 0x159   :  { %v436_v26 = vpop.f32.mrf.mxu0  ;;  %v3470_v21 = vld [vmem:[#allocation13 + $0x738] ss:$76 sps:$4 sm:$0xff]  }
 0x15a   :  { %3761 = vpow2.f32 %v2916_v24  ;;  %v2917_v27 = vmul.f32 -1.442695, %v435_v25  ;;  %440 = vst [vmem:[#allocation16 + $0x8] sm:$0xff] %v435_v25  ;;  %v3475_v24 = vld [vmem:[#allocation13 + $0x69c] ss:$76 sps:$4 sm:$0xff]  }
 0x15b   :  { %v437_v28 = vpop.f32.mrf.mxu0  ;;  %v3473_v26 = vld [vmem:[#allocation13 + $0x698] ss:$76 sps:$4 sm:$0xff]  }
 0x15c   :  { %3763 = vpow2.f32 %v2917_v27  ;;  %v3476_v27 = vld [vmem:[#allocation13 + $0x6a0] ss:$76 sps:$4 sm:$0xff]   ;;  %v3481_v28 = vld [vmem:[#allocation13 + $0x604] ss:$76 sps:$4 sm:$0xff]  }
 0x167   :  { %v3762_v29 = vpop.eup %3761 }
 0x168   :  { %v447_v30 = vadd.f32 1.0, %v3762_v29  ;;  %v3484_v29 = vld [vmem:[#allocation13 + $0x60c] ss:$76 sps:$4 sm:$0xff]  }
 0x169   :  { %v3764_v31 = vpop.eup %3763 }
 0x16a   :  { %3765 = vrcp.f32 %v447_v30  ;;  %v448_v32 = vadd.f32 1.0, %v3764_v31  ;;  %v3479_v30 = vld [vmem:[#allocation13 + $0x600] ss:$76 sps:$4 sm:$0xff]   ;;  %v3482_v31 = vld [vmem:[#allocation13 + $0x608] ss:$76 sps:$4 sm:$0xff]  }
 0x16c   :  { %3767 = vrcp.f32 %v448_v32  ;;  %v3487_v32 = vld [vmem:[#allocation13 + $0x56c] ss:$76 sps:$4 sm:$0xff]  }
 0x177   :  { %v3766_v33 = vpop.eup %3765 }
 0x178   :  { %v453_v35 = vmul.f32 %v3766_v33, %v433_v20  ;;  %v3467_v20 = vld [vmem:[#allocation13 + $0x730] ss:$76 sps:$4 sm:$0xff]   ;;  %v3490_v33 = vld [vmem:[#allocation13 + $0x574] ss:$76 sps:$4 sm:$0xff]  }
 0x179   :  { %v3768_v34 = vpop.eup %3767 }
 0x17a   :  { %v454_v36 = vmul.f32 %v3768_v34, %v435_v25  ;;  %v4062_v40 = vpack.c.bf16 %v453_v35, %v453_v35  ;;  %v3478_v25 = vld [vmem:[#allocation13 + $0x6a4] ss:$76 sps:$4 sm:$0xff]   ;;  %v3485_v34 = vld [vmem:[#allocation13 + $0x568] ss:$76 sps:$4 sm:$0xff]  }
 0x17b   :  { %v3488_v35 = vld [vmem:[#allocation13 + $0x570] ss:$76 sps:$4 sm:$0xff]  }
 0x17c   :  { %v4060_v37 = vpack.c.bf16 %v454_v36, %v454_v36  ;;  %v3493_v36 = vld [vmem:[#allocation13 + $0x4d4] ss:$76 sps:$4 sm:$0xff]  }
 0x17e   :  { %2446 = vmatprep.mubr.bf16.mxu1 %v4060_v37  ;;  %2487 = vmatprep.mubr.bf16.mxu0 %v4060_v37 }
 0x17f   :  { %2447 = vmatmul.mubr.bf16.vlgmr.msra.gmra.mxu1 %v4062_v40  ;;  %2488 = vmatmul.mubr.bf16.vlgmr.msra.gmra.mxu0 %v4062_v40 }
 0x180   :  { %2497 = vmatpush1.bf16.msra.mxu1 %v3401_v38  ;;  %2538 = vmatpush1.bf16.msra.mxu0 %v3404_v39  ;;  %v3496_v38 = vld [vmem:[#allocation13 + $0x4dc] ss:$76 sps:$4 sm:$0xff]  }
 0x181   :  { %2528 = vmatprep.mubr.bf16.mxu1 %v4060_v37  ;;  %2569 = vmatprep.mubr.bf16.mxu0 %v4060_v37  ;;  %v3491_v39 = vld [vmem:[#allocation13 + $0x4d0] ss:$76 sps:$4 sm:$0xff]  }
 0x182   :  { %2498 = vmatprep.subr.bf16.mxu1 %v3409_v41  ;;  %2539 = vmatprep.subr.bf16.mxu0 %v3412_v42  ;;  %v3494_v41 = vld [vmem:[#allocation13 + $0x4d8] ss:$76 sps:$4 sm:$0xff]  }
 0x183   :  { %v3499_v42 = vld [vmem:[#allocation13 + $0x44c] ss:$76 sps:$4 sm:$0xff]  }
 0x184   :  { %2499 = vmatpush1.bf16.msra.mxu1 %v3407_v43  ;;  %2540 = vmatpush1.bf16.msra.mxu0 %v3410_v44  ;;  %v3502_v43 = vld [vmem:[#allocation13 + $0x454] ss:$76 sps:$4 sm:$0xff]  }
 0x185   :  { %2500 = vmatprep.subr.bf16.mxu1 %v3415_v45  ;;  %2541 = vmatprep.subr.bf16.mxu0 %v3418_v46  ;;  %v3497_v44 = vld [vmem:[#allocation13 + $0x448] ss:$76 sps:$4 sm:$0xff]   ;;  %v3500_v45 = vld [vmem:[#allocation13 + $0x450] ss:$76 sps:$4 sm:$0xff]  }
 0x186   :  { %v3505_v46 = vld [vmem:[#allocation13 + $0x3b4] ss:$76 sps:$4 sm:$0xff]  }
 0x188   :  { %2501 = vmatpush1.bf16.msra.mxu1 %v3413_v47  ;;  %2542 = vmatpush1.bf16.msra.mxu0 %v3416_v48  ;;  %v3508_v47 = vld [vmem:[#allocation13 + $0x3bc] ss:$76 sps:$4 sm:$0xff]  }
 0x189   :  { %2502 = vmatprep.subr.bf16.mxu1 %v3421_v49  ;;  %2543 = vmatprep.subr.bf16.mxu0 %v3424_v50  ;;  %v3503_v48 = vld [vmem:[#allocation13 + $0x3b0] ss:$76 sps:$4 sm:$0xff]   ;;  %v3506_v49 = vld [vmem:[#allocation13 + $0x3b8] ss:$76 sps:$4 sm:$0xff]  }
 0x18a   :  { %v3511_v50 = vld [vmem:[#allocation13 + $0x31c] ss:$76 sps:$4 sm:$0xff]  }
 0x18c   :  { %2503 = vmatpush1.bf16.msra.mxu1 %v3419_v51  ;;  %2544 = vmatpush1.bf16.msra.mxu0 %v3422_v52  ;;  %v3514_v51 = vld [vmem:[#allocation13 + $0x324] ss:$76 sps:$4 sm:$0xff]  }
 0x18d   :  { %2504 = vmatprep.subr.bf16.mxu1 %v3427_v53  ;;  %2545 = vmatprep.subr.bf16.mxu0 %v3430_v54  ;;  %v3509_v52 = vld [vmem:[#allocation13 + $0x318] ss:$76 sps:$4 sm:$0xff]   ;;  %v3512_v53 = vld [vmem:[#allocation13 + $0x320] ss:$76 sps:$4 sm:$0xff]  }
 0x18e   :  { %v3517_v54 = vld [vmem:[#allocation13 + $0x284] ss:$76 sps:$4 sm:$0xff]  }
 0x190   :  { %2505 = vmatpush1.bf16.msra.mxu1 %v3425_v55  ;;  %2546 = vmatpush1.bf16.msra.mxu0 %v3428_v56  ;;  %v3520_v55 = vld [vmem:[#allocation13 + $0x28c] ss:$76 sps:$4 sm:$0xff]  }
 0x191   :  { %2506 = vmatprep.subr.bf16.mxu1 %v3433_v57  ;;  %2547 = vmatprep.subr.bf16.mxu0 %v3436_v58  ;;  %v3515_v56 = vld [vmem:[#allocation13 + $0x280] ss:$76 sps:$4 sm:$0xff]   ;;  %v3518_v57 = vld [vmem:[#allocation13 + $0x288] ss:$76 sps:$4 sm:$0xff]  }
 0x192   :  { %v3523_v58 = vld [vmem:[#allocation13 + $0x1ec] ss:$76 sps:$4 sm:$0xff]  }
 0x194   :  { %2507 = vmatpush1.bf16.msra.mxu1 %v3431_v59  ;;  %2548 = vmatpush1.bf16.msra.mxu0 %v3434_v60  ;;  %v3526_v59 = vld [vmem:[#allocation13 + $0x1f4] ss:$76 sps:$4 sm:$0xff]  }
 0x195   :  { %2508 = vmatprep.subr.bf16.mxu1 %v3439_v61  ;;  %2549 = vmatprep.subr.bf16.mxu0 %v3442_v62  ;;  %v3521_v60 = vld [vmem:[#allocation13 + $0x1e8] ss:$76 sps:$4 sm:$0xff]   ;;  %v3524_v61 = vld [vmem:[#allocation13 + $0x1f0] ss:$76 sps:$4 sm:$0xff]  }
 0x196   :  { %v3529_v62 = vld [vmem:[#allocation13 + $0x154] ss:$76 sps:$4 sm:$0xff]  }
 0x198   :  { %2509 = vmatpush1.bf16.msra.mxu1 %v3437_v63  ;;  %2550 = vmatpush1.bf16.msra.mxu0 %v3440_v0  ;;  %v3532_v63 = vld [vmem:[#allocation13 + $0x15c] ss:$76 sps:$4 sm:$0xff]  }
 0x199   :  { %2510 = vmatprep.subr.bf16.mxu1 %v3445_v1  ;;  %2551 = vmatprep.subr.bf16.mxu0 %v3448_v2  ;;  %v3527_v0 = vld [vmem:[#allocation13 + $0x150] ss:$76 sps:$4 sm:$0xff]   ;;  %v3530_v1 = vld [vmem:[#allocation13 + $0x158] ss:$76 sps:$4 sm:$0xff]  }
 0x19a   :  { %v3535_v2 = vld [vmem:[#allocation13 + $0xbc] ss:$76 sps:$4 sm:$0xff]  }
 0x19c   :  { %2511 = vmatpush1.bf16.msra.mxu1 %v3443_v3  ;;  %2552 = vmatpush1.bf16.msra.mxu0 %v3446_v5  ;;  %v3538_v3 = vld [vmem:[#allocation13 + $0xc4] ss:$76 sps:$4 sm:$0xff]  }
 0x19d   :  { %2512 = vmatprep.subr.bf16.mxu1 %v3451_v6  ;;  %2553 = vmatprep.subr.bf16.mxu0 %v3454_v7  ;;  %v3533_v5 = vld [vmem:[#allocation13 + $0xb8] ss:$76 sps:$4 sm:$0xff]   ;;  %v3536_v6 = vld [vmem:[#allocation13 + $0xc0] ss:$76 sps:$4 sm:$0xff]  }
 0x19e   :  { %v3541_v7 = vld [vmem:[#allocation13 + $0x24] ss:$76 sps:$4 sm:$0xff]  }
 0x1a0   :  { %2513 = vmatpush2.bf16.msra.mxu1 %v3449_v8  ;;  %2554 = vmatpush2.bf16.msra.mxu0 %v3452_v9  ;;  %v3544_v8 = vld [vmem:[#allocation13 + $0x2c] ss:$76 sps:$4 sm:$0xff]  }
 0x1a1   :  { %2514 = vmatprep.subr.bf16.mxu1 %v3457_v10  ;;  %2555 = vmatprep.subr.bf16.mxu0 %v3460_v11  ;;  %v3539_v9 = vld [vmem:[#allocation13 + $0x20] ss:$76 sps:$4 sm:$0xff]   ;;  %v3542_v10 = vld [vmem:[#allocation13 + $0x28] ss:$76 sps:$4 sm:$0xff]  }
 0x1a2   :  { %v3547_v11 = vld [vmem:[#allocation13 + $0x90c] ss:$76 sps:$4 sm:$0xff]  }
 0x1a4   :  { %2515 = vmatpush2.bf16.msra.mxu1 %v3455_v12  ;;  %2556 = vmatpush2.bf16.msra.mxu0 %v3458_v13  ;;  %v3550_v12 = vld [vmem:[#allocation13 + $0x914] ss:$76 sps:$4 sm:$0xff]  }
 0x1a5   :  { %2516 = vmatprep.subr.bf16.mxu1 %v3463_v14  ;;  %2557 = vmatprep.subr.bf16.mxu0 %v3466_v15  ;;  %v3545_v13 = vld [vmem:[#allocation13 + $0x908] ss:$76 sps:$4 sm:$0xff]   ;;  %v3548_v14 = vld [vmem:[#allocation13 + $0x910] ss:$76 sps:$4 sm:$0xff]  }
 0x1a6   :  { %v3553_v15 = vld [vmem:[#allocation13 + $0x874] ss:$76 sps:$4 sm:$0xff]  }
 0x1a8   :  { %2517 = vmatpush2.bf16.msra.mxu1 %v3461_v16  ;;  %2558 = vmatpush2.bf16.msra.mxu0 %v3464_v17  ;;  %v3556_v16 = vld [vmem:[#allocation13 + $0x87c] ss:$76 sps:$4 sm:$0xff]  }
 0x1a9   :  { %2518 = vmatprep.subr.bf16.mxu1 %v3469_v18  ;;  %2559 = vmatprep.subr.bf16.mxu0 %v3472_v19  ;;  %v3551_v17 = vld [vmem:[#allocation13 + $0x870] ss:$76 sps:$4 sm:$0xff]   ;;  %v3554_v18 = vld [vmem:[#allocation13 + $0x878] ss:$76 sps:$4 sm:$0xff]  }
 0x1aa   :  { %v3559_v19 = vld [vmem:[#allocation13 + $0x7dc] ss:$76 sps:$4 sm:$0xff]  }
 0x1ac   :  { %2519 = vmatpush2.bf16.msra.mxu1 %v3467_v20  ;;  %2560 = vmatpush2.bf16.msra.mxu0 %v3470_v21  ;;  %v3562_v20 = vld [vmem:[#allocation13 + $0x7e4] ss:$76 sps:$4 sm:$0xff]  }
 0x1ad   :  { %2520 = vmatprep.subr.bf16.mxu1 %v3475_v24  ;;  %2561 = vmatprep.subr.bf16.mxu0 %v3478_v25  ;;  %v3557_v21 = vld [vmem:[#allocation13 + $0x7d8] ss:$76 sps:$4 sm:$0xff]   ;;  %v3560_v24 = vld [vmem:[#allocation13 + $0x7e0] ss:$76 sps:$4 sm:$0xff]  }
 0x1ae   :  { %v3565_v25 = vld [vmem:[#allocation13 + $0x744] ss:$76 sps:$4 sm:$0xff]  }
 0x1b0   :  { %2521 = vmatpush2.bf16.msra.mxu1 %v3473_v26  ;;  %2562 = vmatpush2.bf16.msra.mxu0 %v3476_v27  ;;  %v3568_v26 = vld [vmem:[#allocation13 + $0x74c] ss:$76 sps:$4 sm:$0xff]  }
 0x1b1   :  { %2522 = vmatprep.subr.bf16.mxu1 %v3481_v28  ;;  %2563 = vmatprep.subr.bf16.mxu0 %v3484_v29  ;;  %v3563_v27 = vld [vmem:[#allocation13 + $0x740] ss:$76 sps:$4 sm:$0xff]   ;;  %v3566_v28 = vld [vmem:[#allocation13 + $0x748] ss:$76 sps:$4 sm:$0xff]  }
 0x1b2   :  { %v3571_v29 = vld [vmem:[#allocation13 + $0x6ac] ss:$76 sps:$4 sm:$0xff]  }
 0x1b4   :  { %2523 = vmatpush2.bf16.msra.mxu1 %v3479_v30  ;;  %2564 = vmatpush2.bf16.msra.mxu0 %v3482_v31  ;;  %v3574_v30 = vld [vmem:[#allocation13 + $0x6b4] ss:$76 sps:$4 sm:$0xff]  }
 0x1b5   :  { %2524 = vmatprep.subr.bf16.mxu1 %v3487_v32  ;;  %2565 = vmatprep.subr.bf16.mxu0 %v3490_v33  ;;  %v3569_v31 = vld [vmem:[#allocation13 + $0x6a8] ss:$76 sps:$4 sm:$0xff]   ;;  %v3572_v32 = vld [vmem:[#allocation13 + $0x6b0] ss:$76 sps:$4 sm:$0xff]  }
 0x1b6   :  { %v3577_v33 = vld [vmem:[#allocation13 + $0x614] ss:$76 sps:$4 sm:$0xff]  }
 0x1b8   :  { %2525 = vmatpush2.bf16.msra.mxu1 %v3485_v34  ;;  %2566 = vmatpush2.bf16.msra.mxu0 %v3488_v35  ;;  %v3580_v34 = vld [vmem:[#allocation13 + $0x61c] ss:$76 sps:$4 sm:$0xff]  }
 0x1b9   :  { %2526 = vmatprep.subr.bf16.mxu1 %v3493_v36  ;;  %2567 = vmatprep.subr.bf16.mxu0 %v3496_v38  ;;  %v3575_v35 = vld [vmem:[#allocation13 + $0x610] ss:$76 sps:$4 sm:$0xff]   ;;  %v3578_v36 = vld [vmem:[#allocation13 + $0x618] ss:$76 sps:$4 sm:$0xff]  }
 0x1ba   :  { %v3583_v38 = vld [vmem:[#allocation13 + $0x57c] ss:$76 sps:$4 sm:$0xff]  }
 0x1bc   :  { %2527 = vmatpush2.bf16.msra.mxu1 %v3491_v39  ;;  %2568 = vmatpush2.bf16.msra.mxu0 %v3494_v41  ;;  %v3586_v39 = vld [vmem:[#allocation13 + $0x584] ss:$76 sps:$4 sm:$0xff]  }
 0x1bd   :  { %2578 = vmatprep.subr.bf16.mxu1 %v3499_v42  ;;  %2619 = vmatprep.subr.bf16.mxu0 %v3502_v43  ;;  %v3581_v41 = vld [vmem:[#allocation13 + $0x578] ss:$76 sps:$4 sm:$0xff]   ;;  %v3584_v42 = vld [vmem:[#allocation13 + $0x580] ss:$76 sps:$4 sm:$0xff]  }
 0x1be   :  { %v3589_v43 = vld [vmem:[#allocation13 + $0x4e4] ss:$76 sps:$4 sm:$0xff]  }
 0x1bf   :  { %2529 = vmatmul.mubr.bf16.vlgmr.msra.gmra.mxu1 %v4062_v40  ;;  %2570 = vmatmul.mubr.bf16.vlgmr.msra.gmra.mxu0 %v4062_v40 }
 0x1c0   :  { %2579 = vmatpush1.bf16.msra.mxu1 %v3497_v44  ;;  %2610 = vmatprep.mubr.bf16.mxu1 %v4060_v37  ;;  %v3592_v44 = vld [vmem:[#allocation13 + $0x4ec] ss:$76 sps:$4 sm:$0xff]  }
 0x1c1   :  { %2620 = vmatpush1.bf16.msra.mxu0 %v3500_v45  ;;  %2651 = vmatprep.mubr.bf16.mxu0 %v4060_v37  ;;  %v3587_v45 = vld [vmem:[#allocation13 + $0x4e0] ss:$76 sps:$4 sm:$0xff]  }
 0x1c2   :  { %2580 = vmatprep.subr.bf16.mxu1 %v3505_v46  ;;  %2621 = vmatprep.subr.bf16.mxu0 %v3508_v47  ;;  %v3590_v46 = vld [vmem:[#allocation13 + $0x4e8] ss:$76 sps:$4 sm:$0xff]  }
 0x1c3   :  { %v3595_v47 = vld [vmem:[#allocation13 + $0x45c] ss:$76 sps:$4 sm:$0xff]  }
 0x1c4   :  { %2581 = vmatpush1.bf16.msra.mxu1 %v3503_v48  ;;  %v3598_v48 = vld [vmem:[#allocation13 + $0x464] ss:$76 sps:$4 sm:$0xff]  }
 0x1c5   :  { %2622 = vmatpush1.bf16.msra.mxu0 %v3506_v49  ;;  %2582 = vmatprep.subr.bf16.mxu1 %v3511_v50  ;;  %v3593_v49 = vld [vmem:[#allocation13 + $0x458] ss:$76 sps:$4 sm:$0xff]   ;;  %v3596_v50 = vld [vmem:[#allocation13 + $0x460] ss:$76 sps:$4 sm:$0xff]  }
 0x1c6   :  { %2623 = vmatprep.subr.bf16.mxu0 %v3514_v51  ;;  %v3601_v51 = vld [vmem:[#allocation13 + $0x3c4] ss:$76 sps:$4 sm:$0xff]  }
 0x1c8   :  { %2583 = vmatpush1.bf16.msra.mxu1 %v3509_v52  ;;  %v3604_v52 = vld [vmem:[#allocation13 + $0x3cc] ss:$76 sps:$4 sm:$0xff]  }
 0x1c9   :  { %2624 = vmatpush1.bf16.msra.mxu0 %v3512_v53  ;;  %2584 = vmatprep.subr.bf16.mxu1 %v3517_v54  ;;  %v3599_v53 = vld [vmem:[#allocation13 + $0x3c0] ss:$76 sps:$4 sm:$0xff]   ;;  %v3602_v54 = vld [vmem:[#allocation13 + $0x3c8] ss:$76 sps:$4 sm:$0xff]  }
 0x1ca   :  { %2625 = vmatprep.subr.bf16.mxu0 %v3520_v55  ;;  %v3607_v55 = vld [vmem:[#allocation13 + $0x32c] ss:$76 sps:$4 sm:$0xff]  }
 0x1cc   :  { %2585 = vmatpush1.bf16.msra.mxu1 %v3515_v56  ;;  %v3610_v56 = vld [vmem:[#allocation13 + $0x334] ss:$76 sps:$4 sm:$0xff]  }
 0x1cd   :  { %2626 = vmatpush1.bf16.msra.mxu0 %v3518_v57  ;;  %2586 = vmatprep.subr.bf16.mxu1 %v3523_v58  ;;  %v3605_v57 = vld [vmem:[#allocation13 + $0x328] ss:$76 sps:$4 sm:$0xff]   ;;  %v3608_v58 = vld [vmem:[#allocation13 + $0x330] ss:$76 sps:$4 sm:$0xff]  }
 0x1ce   :  { %2627 = vmatprep.subr.bf16.mxu0 %v3526_v59  ;;  %v3613_v59 = vld [vmem:[#allocation13 + $0x294] ss:$76 sps:$4 sm:$0xff]  }
 0x1d0   :  { %2587 = vmatpush1.bf16.msra.mxu1 %v3521_v60  ;;  %v3616_v60 = vld [vmem:[#allocation13 + $0x29c] ss:$76 sps:$4 sm:$0xff]  }
 0x1d1   :  { %2628 = vmatpush1.bf16.msra.mxu0 %v3524_v61  ;;  %2588 = vmatprep.subr.bf16.mxu1 %v3529_v62  ;;  %v3611_v61 = vld [vmem:[#allocation13 + $0x290] ss:$76 sps:$4 sm:$0xff]   ;;  %v3614_v62 = vld [vmem:[#allocation13 + $0x298] ss:$76 sps:$4 sm:$0xff]  }
 0x1d2   :  { %2629 = vmatprep.subr.bf16.mxu0 %v3532_v63  ;;  %v3619_v63 = vld [vmem:[#allocation13 + $0x1fc] ss:$76 sps:$4 sm:$0xff]  }
 0x1d4   :  { %2589 = vmatpush1.bf16.msra.mxu1 %v3527_v0  ;;  %v3622_v0 = vld [vmem:[#allocation13 + $0x204] ss:$76 sps:$4 sm:$0xff]  }
 0x1d5   :  { %2630 = vmatpush1.bf16.msra.mxu0 %v3530_v1  ;;  %2590 = vmatprep.subr.bf16.mxu1 %v3535_v2  ;;  %v3617_v1 = vld [vmem:[#allocation13 + $0x1f8] ss:$76 sps:$4 sm:$0xff]   ;;  %v3620_v2 = vld [vmem:[#allocation13 + $0x200] ss:$76 sps:$4 sm:$0xff]  }
 0x1d6   :  { %2631 = vmatprep.subr.bf16.mxu0 %v3538_v3  ;;  %v3625_v3 = vld [vmem:[#allocation13 + $0x164] ss:$76 sps:$4 sm:$0xff]  }
 0x1d8   :  { %2591 = vmatpush1.bf16.msra.mxu1 %v3533_v5  ;;  %v3628_v5 = vld [vmem:[#allocation13 + $0x16c] ss:$76 sps:$4 sm:$0xff]  }
 0x1d9   :  { %2632 = vmatpush1.bf16.msra.mxu0 %v3536_v6  ;;  %2592 = vmatprep.subr.bf16.mxu1 %v3541_v7  ;;  %v3623_v6 = vld [vmem:[#allocation13 + $0x160] ss:$76 sps:$4 sm:$0xff]   ;;  %v3626_v7 = vld [vmem:[#allocation13 + $0x168] ss:$76 sps:$4 sm:$0xff]  }
 0x1da   :  { %2633 = vmatprep.subr.bf16.mxu0 %v3544_v8  ;;  %v3631_v8 = vld [vmem:[#allocation13 + $0xcc] ss:$76 sps:$4 sm:$0xff]  }
 0x1dc   :  { %2593 = vmatpush1.bf16.msra.mxu1 %v3539_v9  ;;  %v3634_v9 = vld [vmem:[#allocation13 + $0xd4] ss:$76 sps:$4 sm:$0xff]  }
 0x1dd   :  { %2634 = vmatpush1.bf16.msra.mxu0 %v3542_v10  ;;  %2594 = vmatprep.subr.bf16.mxu1 %v3547_v11  ;;  %v3629_v10 = vld [vmem:[#allocation13 + $0xc8] ss:$76 sps:$4 sm:$0xff]   ;;  %v3632_v11 = vld [vmem:[#allocation13 + $0xd0] ss:$76 sps:$4 sm:$0xff]  }
 0x1de   :  { %2635 = vmatprep.subr.bf16.mxu0 %v3550_v12  ;;  %v3637_v12 = vld [vmem:[#allocation13 + $0x34] ss:$76 sps:$4 sm:$0xff]  }
 0x1e0   :  { %2595 = vmatpush2.bf16.msra.mxu1 %v3545_v13  ;;  %v3640_v13 = vld [vmem:[#allocation13 + $0x3c] ss:$76 sps:$4 sm:$0xff]  }
 0x1e1   :  { %2636 = vmatpush2.bf16.msra.mxu0 %v3548_v14  ;;  %2596 = vmatprep.subr.bf16.mxu1 %v3553_v15  ;;  %v3635_v14 = vld [vmem:[#allocation13 + $0x30] ss:$76 sps:$4 sm:$0xff]   ;;  %v3638_v15 = vld [vmem:[#allocation13 + $0x38] ss:$76 sps:$4 sm:$0xff]  }
 0x1e2   :  { %2637 = vmatprep.subr.bf16.mxu0 %v3556_v16  ;;  %v3643_v16 = vld [vmem:[#allocation13 + $0x91c] ss:$76 sps:$4 sm:$0xff]  }
 0x1e4   :  { %2597 = vmatpush2.bf16.msra.mxu1 %v3551_v17  ;;  %v3646_v17 = vld [vmem:[#allocation13 + $0x924] ss:$76 sps:$4 sm:$0xff]  }
 0x1e5   :  { %2638 = vmatpush2.bf16.msra.mxu0 %v3554_v18  ;;  %2598 = vmatprep.subr.bf16.mxu1 %v3559_v19  ;;  %v3641_v18 = vld [vmem:[#allocation13 + $0x918] ss:$76 sps:$4 sm:$0xff]   ;;  %v3644_v19 = vld [vmem:[#allocation13 + $0x920] ss:$76 sps:$4 sm:$0xff]  }
 0x1e6   :  { %2639 = vmatprep.subr.bf16.mxu0 %v3562_v20  ;;  %v3649_v20 = vld [vmem:[#allocation13 + $0x884] ss:$76 sps:$4 sm:$0xff]  }
 0x1e8   :  { %2599 = vmatpush2.bf16.msra.mxu1 %v3557_v21  ;;  %v3652_v21 = vld [vmem:[#allocation13 + $0x88c] ss:$76 sps:$4 sm:$0xff]  }
 0x1e9   :  { %2640 = vmatpush2.bf16.msra.mxu0 %v3560_v24  ;;  %2600 = vmatprep.subr.bf16.mxu1 %v3565_v25  ;;  %v3647_v24 = vld [vmem:[#allocation13 + $0x880] ss:$76 sps:$4 sm:$0xff]   ;;  %v3650_v25 = vld [vmem:[#allocation13 + $0x888] ss:$76 sps:$4 sm:$0xff]  }
 0x1ea   :  { %2641 = vmatprep.subr.bf16.mxu0 %v3568_v26  ;;  %v3655_v26 = vld [vmem:[#allocation13 + $0x7ec] ss:$76 sps:$4 sm:$0xff]  }
 0x1ec   :  { %2601 = vmatpush2.bf16.msra.mxu1 %v3563_v27  ;;  %v3658_v27 = vld [vmem:[#allocation13 + $0x7f4] ss:$76 sps:$4 sm:$0xff]  }
 0x1ed   :  { %2642 = vmatpush2.bf16.msra.mxu0 %v3566_v28  ;;  %2602 = vmatprep.subr.bf16.mxu1 %v3571_v29  ;;  %v3653_v28 = vld [vmem:[#allocation13 + $0x7e8] ss:$76 sps:$4 sm:$0xff]   ;;  %v3656_v29 = vld [vmem:[#allocation13 + $0x7f0] ss:$76 sps:$4 sm:$0xff]  }
 0x1ee   :  { %2643 = vmatprep.subr.bf16.mxu0 %v3574_v30  ;;  %v3661_v30 = vld [vmem:[#allocation13 + $0x754] ss:$76 sps:$4 sm:$0xff]  }
 0x1f0   :  { %2603 = vmatpush2.bf16.msra.mxu1 %v3569_v31  ;;  %v3664_v31 = vld [vmem:[#allocation13 + $0x75c] ss:$76 sps:$4 sm:$0xff]  }
 0x1f1   :  { %2644 = vmatpush2.bf16.msra.mxu0 %v3572_v32  ;;  %2604 = vmatprep.subr.bf16.mxu1 %v3577_v33  ;;  %v3659_v32 = vld [vmem:[#allocation13 + $0x750] ss:$76 sps:$4 sm:$0xff]   ;;  %v3662_v33 = vld [vmem:[#allocation13 + $0x758] ss:$76 sps:$4 sm:$0xff]  }
 0x1f2   :  { %2645 = vmatprep.subr.bf16.mxu0 %v3580_v34  ;;  %v3667_v34 = vld [vmem:[#allocation13 + $0x6bc] ss:$76 sps:$4 sm:$0xff]  }
 0x1f4   :  { %2605 = vmatpush2.bf16.msra.mxu1 %v3575_v35  ;;  %v3670_v35 = vld [vmem:[#allocation13 + $0x6c4] ss:$76 sps:$4 sm:$0xff]  }
 0x1f5   :  { %2646 = vmatpush2.bf16.msra.mxu0 %v3578_v36  ;;  %2606 = vmatprep.subr.bf16.mxu1 %v3583_v38  ;;  %v3665_v36 = vld [vmem:[#allocation13 + $0x6b8] ss:$76 sps:$4 sm:$0xff]   ;;  %v3668_v38 = vld [vmem:[#allocation13 + $0x6c0] ss:$76 sps:$4 sm:$0xff]  }
 0x1f6   :  { %2647 = vmatprep.subr.bf16.mxu0 %v3586_v39  ;;  %v3673_v39 = vld [vmem:[#allocation13 + $0x624] ss:$76 sps:$4 sm:$0xff]  }
 0x1f8   :  { %2607 = vmatpush2.bf16.msra.mxu1 %v3581_v41  ;;  %v3676_v41 = vld [vmem:[#allocation13 + $0x62c] ss:$76 sps:$4 sm:$0xff]  }
 0x1f9   :  { %2648 = vmatpush2.bf16.msra.mxu0 %v3584_v42  ;;  %2608 = vmatprep.subr.bf16.mxu1 %v3589_v43  ;;  %v3671_v42 = vld [vmem:[#allocation13 + $0x620] ss:$76 sps:$4 sm:$0xff]   ;;  %v3674_v43 = vld [vmem:[#allocation13 + $0x628] ss:$76 sps:$4 sm:$0xff]  }
 0x1fa   :  { %2649 = vmatprep.subr.bf16.mxu0 %v3592_v44  ;;  %v3679_v44 = vld [vmem:[#allocation13 + $0x58c] ss:$76 sps:$4 sm:$0xff]  }
 0x1fc   :  { %2609 = vmatpush2.bf16.msra.mxu1 %v3587_v45  ;;  %v3682_v45 = vld [vmem:[#allocation13 + $0x594] ss:$76 sps:$4 sm:$0xff]  }
 0x1fd   :  { %2650 = vmatpush2.bf16.msra.mxu0 %v3590_v46  ;;  %2660 = vmatprep.subr.bf16.mxu1 %v3595_v47  ;;  %v3677_v46 = vld [vmem:[#allocation13 + $0x588] ss:$76 sps:$4 sm:$0xff]   ;;  %v3680_v47 = vld [vmem:[#allocation13 + $0x590] ss:$76 sps:$4 sm:$0xff]  }
 0x1fe   :  { %2701 = vmatprep.subr.bf16.mxu0 %v3598_v48  ;;  %v3685_v48 = vld [vmem:[#allocation13 + $0x4f4] ss:$76 sps:$4 sm:$0xff]  }
 0x1ff   :  { %2611 = vmatmul.mubr.bf16.vlgmr.msra.gmra.mxu1 %v4062_v40 }
 0x200   :  { %2652 = vmatmul.mubr.bf16.vlgmr.msra.gmra.mxu0 %v4062_v40  ;;  %2661 = vmatpush1.bf16.msra.mxu1 %v3593_v49  ;;  %v3688_v49 = vld [vmem:[#allocation13 + $0x4fc] ss:$76 sps:$4 sm:$0xff]  }
 0x201   :  { %2692 = vmatprep.mubr.bf16.mxu1 %v4060_v37  ;;  %2702 = vmatpush1.bf16.msra.mxu0 %v3596_v50  ;;  %v3683_v50 = vld [vmem:[#allocation13 + $0x4f0] ss:$76 sps:$4 sm:$0xff]  }
 0x202   :  { %2733 = vmatprep.mubr.bf16.mxu0 %v4060_v37  ;;  %2662 = vmatprep.subr.bf16.mxu1 %v3601_v51  ;;  %v4079_v51 = vsub.s32 2, %v4030_v4 }
 0x203   :  { %2703 = vmatprep.subr.bf16.mxu0 %v3604_v52  ;;  %v3686_v52 = vld [vmem:[#allocation13 + $0x4f8] ss:$76 sps:$4 sm:$0xff]  }
 0x204   :  { %2663 = vmatpush1.bf16.msra.mxu1 %v3599_v53  ;;  %v3691_v53 = vld [vmem:[#allocation13 + $0x46c] ss:$76 sps:$4 sm:$0xff]  }
 0x205   :  { %2704 = vmatpush1.bf16.msra.mxu0 %v3602_v54  ;;  %2664 = vmatprep.subr.bf16.mxu1 %v3607_v55  ;;  %v4081_v54 = vld [vmem:[#allocation14] sm:$0xff]  ;;  %v3692_v55 = vld [vmem:[#allocation13 + $0x930] ss:$76 sps:$4 sm:$0xff]  }
 0x206   :  { %2705 = vmatprep.subr.bf16.mxu0 %v3610_v56  ;;  %v797_v56 = vsub.s32 3, %v4030_v4 }
 0x208   :  { %2665 = vmatpush1.bf16.msra.mxu1 %v3605_v57  ;;  %v3689_v57 = vld [vmem:[#allocation13 + $0x468] ss:$76 sps:$4 sm:$0xff]  }
 0x209   :  { %2706 = vmatpush1.bf16.msra.mxu0 %v3608_v58  ;;  %2666 = vmatprep.subr.bf16.mxu1 %v3613_v59  ;;  %v786_v58 = vrot.slane %v4081_v54, %v4039_v22  ;;  %v794_v59 = vrot.slane %v4081_v54, %v4079_v51 }
 0x20a   :  { %2707 = vmatprep.subr.bf16.mxu0 %v3616_v60  ;;  %v3693_v60 = vld [vmem:[#allocation13 + $0x470] ss:$76 sps:$4 sm:$0xff]  }
 0x20c   :  { %2667 = vmatpush1.bf16.msra.mxu1 %v3611_v61  ;;  %v790_v61 = vrot.slane %v4081_v54, %v4042_v23 }
 0x20d   :  { %2708 = vmatpush1.bf16.msra.mxu0 %v3614_v62  ;;  %2668 = vmatprep.subr.bf16.mxu1 %v3619_v63  ;;  %v798_v62 = vrot.slane %v4081_v54, %v797_v56  ;;  %v3696_v63 = vld [vmem:[#allocation13 + $0x3d4] ss:$76 sps:$4 sm:$0xff]  }
 0x20e   :  { %2709 = vmatprep.subr.bf16.mxu0 %v3622_v0 }
 0x210   :  { %2669 = vmatpush1.bf16.msra.mxu1 %v3617_v1 }
 0x211   :  { %2710 = vmatpush1.bf16.msra.mxu0 %v3620_v2  ;;  %2670 = vmatprep.subr.bf16.mxu1 %v3625_v3  ;;  %v3697_v2 = vld [vmem:[#allocation13 + $0x898] ss:$76 sps:$4 sm:$0xff]  }
 0x212   :  { %2711 = vmatprep.subr.bf16.mxu0 %v3628_v5 }
 0x214   :  { %2671 = vmatpush1.bf16.msra.mxu1 %v3623_v6  ;;  %v3694_v6 = vld [vmem:[#allocation13 + $0x3d0] ss:$76 sps:$4 sm:$0xff]  }
 0x215   :  { %2712 = vmatpush1.bf16.msra.mxu0 %v3626_v7  ;;  %2672 = vmatprep.subr.bf16.mxu1 %v3631_v8 }
 0x216   :  { %2713 = vmatprep.subr.bf16.mxu0 %v3634_v9  ;;  %v3698_v9 = vld [vmem:[#allocation13 + $0x3d8] ss:$76 sps:$4 sm:$0xff]  }
 0x218   :  { %2673 = vmatpush1.bf16.msra.mxu1 %v3629_v10  ;;  %v3701_v10 = vld [vmem:[#allocation13 + $0x33c] ss:$76 sps:$4 sm:$0xff]  }
 0x219   :  { %2714 = vmatpush1.bf16.msra.mxu0 %v3632_v11  ;;  %2674 = vmatprep.subr.bf16.mxu1 %v3637_v12 }
 0x21a   :  { %2715 = vmatprep.subr.bf16.mxu0 %v3640_v13  ;;  %v3702_v13 = vld [vmem:[#allocation13 + $0x800] ss:$76 sps:$4 sm:$0xff]  }
 0x21c   :  { %2675 = vmatpush1.bf16.msra.mxu1 %v3635_v14 }
 0x21d   :  { %2716 = vmatpush1.bf16.msra.mxu0 %v3638_v15  ;;  %2676 = vmatprep.subr.bf16.mxu1 %v3643_v16  ;;  %v3699_v16 = vld [vmem:[#allocation13 + $0x338] ss:$76 sps:$4 sm:$0xff]  }
 0x21e   :  { %2717 = vmatprep.subr.bf16.mxu0 %v3646_v17 }
 0x220   :  { %2677 = vmatpush2.bf16.msra.mxu1 %v3641_v18 }
 0x221   :  { %2718 = vmatpush2.bf16.msra.mxu0 %v3644_v19  ;;  %2678 = vmatprep.subr.bf16.mxu1 %v3649_v20  ;;  %v3703_v19 = vld [vmem:[#allocation13 + $0x340] ss:$76 sps:$4 sm:$0xff]   ;;  %v3706_v20 = vld [vmem:[#allocation13 + $0x2a4] ss:$76 sps:$4 sm:$0xff]  }
 0x222   :  { %2719 = vmatprep.subr.bf16.mxu0 %v3652_v21  ;;  %v3707_v21 = vld [vmem:[#allocation13 + $0x768] ss:$76 sps:$4 sm:$0xff]  }
 0x224   :  { %2679 = vmatpush2.bf16.msra.mxu1 %v3647_v24  ;;  %v3708_v24 = vld [vmem:[#allocation13 + $0x2a8] ss:$76 sps:$4 sm:$0xff]  }
 0x225   :  { %2720 = vmatpush2.bf16.msra.mxu0 %v3650_v25  ;;  %2680 = vmatprep.subr.bf16.mxu1 %v3655_v26  ;;  %v3711_v25 = vld [vmem:[#allocation13 + $0x20c] ss:$76 sps:$4 sm:$0xff]   ;;  %v3712_v26 = vld [vmem:[#allocation13 + $0x6d0] ss:$76 sps:$4 sm:$0xff]  }
 0x226   :  { %2721 = vmatprep.subr.bf16.mxu0 %v3658_v27  ;;  %v3709_v27 = vld [vmem:[#allocation13 + $0x208] ss:$76 sps:$4 sm:$0xff]  }
 0x228   :  { %2681 = vmatpush2.bf16.msra.mxu1 %v3653_v28  ;;  %v3713_v28 = vld [vmem:[#allocation13 + $0x210] ss:$76 sps:$4 sm:$0xff]  }
 0x229   :  { %2722 = vmatpush2.bf16.msra.mxu0 %v3656_v29  ;;  %2682 = vmatprep.subr.bf16.mxu1 %v3661_v30  ;;  %v3716_v29 = vld [vmem:[#allocation13 + $0x174] ss:$76 sps:$4 sm:$0xff]   ;;  %v3717_v30 = vld [vmem:[#allocation13 + $0x638] ss:$76 sps:$4 sm:$0xff]  }
 0x22a   :  { %2723 = vmatprep.subr.bf16.mxu0 %v3664_v31  ;;  %v3714_v31 = vld [vmem:[#allocation13 + $0x170] ss:$76 sps:$4 sm:$0xff]  }
 0x22c   :  { %2683 = vmatpush2.bf16.msra.mxu1 %v3659_v32  ;;  %v3718_v32 = vld [vmem:[#allocation13 + $0x178] ss:$76 sps:$4 sm:$0xff]  }
 0x22d   :  { %2724 = vmatpush2.bf16.msra.mxu0 %v3662_v33  ;;  %2684 = vmatprep.subr.bf16.mxu1 %v3667_v34  ;;  %v3721_v33 = vld [vmem:[#allocation13 + $0xdc] ss:$76 sps:$4 sm:$0xff]   ;;  %v3722_v34 = vld [vmem:[#allocation13 + $0x5a0] ss:$76 sps:$4 sm:$0xff]  }
 0x22e   :  { %2725 = vmatprep.subr.bf16.mxu0 %v3670_v35  ;;  %v3719_v35 = vld [vmem:[#allocation13 + $0xd8] ss:$76 sps:$4 sm:$0xff]  }
 0x230   :  { %2685 = vmatpush2.bf16.msra.mxu1 %v3665_v36  ;;  %v3723_v36 = vld [vmem:[#allocation13 + $0xe0] ss:$76 sps:$4 sm:$0xff]  }
 0x231   :  { %2726 = vmatpush2.bf16.msra.mxu0 %v3668_v38  ;;  %2686 = vmatprep.subr.bf16.mxu1 %v3673_v39  ;;  %v3726_v38 = vld [vmem:[#allocation13 + $0x44] ss:$76 sps:$4 sm:$0xff]   ;;  %v3727_v39 = vld [vmem:[#allocation13 + $0x508] ss:$76 sps:$4 sm:$0xff]  }
 0x232   :  { %2727 = vmatprep.subr.bf16.mxu0 %v3676_v41  ;;  %v3724_v41 = vld [vmem:[#allocation13 + $0x40] ss:$76 sps:$4 sm:$0xff]  }
 0x234   :  { %2687 = vmatpush2.bf16.msra.mxu1 %v3671_v42  ;;  %v3728_v42 = vld [vmem:[#allocation13 + $0x48] ss:$76 sps:$4 sm:$0xff]  }
 0x235   :  { %2728 = vmatpush2.bf16.msra.mxu0 %v3674_v43  ;;  %2688 = vmatprep.subr.bf16.mxu1 %v3679_v44  ;;  %v3731_v43 = vld [vmem:[#allocation13 + $0x92c] ss:$76 sps:$4 sm:$0xff]   ;;  %v3729_v44 = vld [vmem:[#allocation13 + $0x928] ss:$76 sps:$4 sm:$0xff]  }
 0x236   :  { %2729 = vmatprep.subr.bf16.mxu0 %v3682_v45  ;;  %v3734_v45 = vld [vmem:[#allocation13 + $0x894] ss:$76 sps:$4 sm:$0xff]  }
 0x238   :  { %2689 = vmatpush2.bf16.msra.mxu1 %v3677_v46  ;;  %v3732_v46 = vld [vmem:[#allocation13 + $0x890] ss:$76 sps:$4 sm:$0xff]  }
 0x239   :  { %2730 = vmatpush2.bf16.msra.mxu0 %v3680_v47  ;;  %2690 = vmatprep.subr.bf16.mxu1 %v3685_v48  ;;  %v3737_v47 = vld [vmem:[#allocation13 + $0x7fc] ss:$76 sps:$4 sm:$0xff]   ;;  %v3735_v48 = vld [vmem:[#allocation13 + $0x7f8] ss:$76 sps:$4 sm:$0xff]  }
 0x23a   :  { %2731 = vmatprep.subr.bf16.mxu0 %v3688_v49  ;;  %v3740_v49 = vld [vmem:[#allocation13 + $0x764] ss:$76 sps:$4 sm:$0xff]  }
 0x23c   :  { %2691 = vmatpush2.bf16.msra.mxu1 %v3683_v50  ;;  %v3738_v50 = vld [vmem:[#allocation13 + $0x760] ss:$76 sps:$4 sm:$0xff]  }
 0x23d   :  { %2732 = vmatpush2.bf16.msra.mxu0 %v3686_v52  ;;  %2742 = vmatprep.subr.bf16.mxu1 %v3691_v53  ;;  %v3743_v52 = vld [vmem:[#allocation13 + $0x6cc] ss:$76 sps:$4 sm:$0xff]   ;;  %v3741_v53 = vld [vmem:[#allocation13 + $0x6c8] ss:$76 sps:$4 sm:$0xff]  }
 0x23e   :  { %3222 = vmatprep.subr.bf16.mxu0 %v3692_v55  ;;  %v3746_v55 = vld [vmem:[#allocation13 + $0x634] ss:$76 sps:$4 sm:$0xff]  }
 0x23f   :  { %2693 = vmatmul.mubr.bf16.vlgmr.msra.gmra.mxu1 %v4062_v40  ;;  %v2448_v0 = vpop.f32.mrf.mxu1  ;;  %v2489_v1 = vpop.f32.mrf.mxu0 }
 0x240   :  { %2734 = vmatmul.mubr.bf16.vlgmr.msra.gmra.mxu0 %v4062_v40  ;;  %v2449_v3 = vadd.f32 %v2448_v0, %v786_v58  ;;  %v2490_v5 = vadd.f32 %v2489_v1, %v794_v59  ;;  %2743 = vmatpush1.bf16.msra.mxu1 %v3689_v57  ;;  %v3744_v57 = vld [vmem:[#allocation13 + $0x630] ss:$76 sps:$4 sm:$0xff]   ;;  %v3747_v59 = vld [vmem:[#allocation13 + $0x598] ss:$76 sps:$4 sm:$0xff]   ;;  %v805_v0 = vsub.s32 5, %v4030_v4  ;;  %v813_v1 = vsub.s32 7, %v4030_v4 }
 0x241   :  { %2774 = vmatprep.mubr.bf16.mxu1 %v4060_v37  ;;  %3223 = vmatpush3.bf16.msra.mxu0 %v3693_v60  ;;  %v2450_v7 = vpop.f32.mrf.mxu1  ;;  %v2491_v8 = vpop.f32.mrf.mxu0  ;;  %v3749_v58 = vld [vmem:[#allocation13 + $0x59c] ss:$76 sps:$4 sm:$0xff]   ;;  %v3752_v60 = vld [vmem:[#allocation13 + $0x504] ss:$76 sps:$4 sm:$0xff]  }
 0x242   :  { %2823 = vst [vmem:[#allocation17] sm:$0xff] %v2449_v3  ;;  %2825 = vst [vmem:[#allocation17 + $0x10] sm:$0xff] %v2490_v5  ;;  %2815 = vmatprep.mubr.bf16.mxu0 %v4060_v37  ;;  %v2451_v11 = vadd.f32 %v2450_v7, %v790_v61  ;;  %v2492_v12 = vadd.f32 %v2491_v8, %v798_v62  ;;  %2744 = vmatprep.subr.bf16.mxu1 %v3696_v63  ;;  %v3704_v37 = vld [vmem:[#allocation13 + $0x2a0] ss:$76 sps:$4 sm:$0xff]   ;;  %v801_v62 = vsub.s32 4, %v4030_v4 }
 0x243   :  { %3224 = vmatprep.subr.bf16.mxu0 %v3697_v2  ;;  %v2452_v14 = vpop.f32.mrf.mxu1  ;;  %v2493_v15 = vpop.f32.mrf.mxu0  ;;  %v3750_v61 = vld [vmem:[#allocation13 + $0x500] ss:$76 sps:$4 sm:$0xff]   ;;  %v809_v63 = vsub.s32 6, %v4030_v4  ;;  %v806_v5 = vrot.slane %v4081_v54, %v805_v0 }
 0x244   :  { %2824 = vst [vmem:[#allocation17 + $0x8] sm:$0xff] %v2451_v11  ;;  %2826 = vst [vmem:[#allocation17 + $0x18] sm:$0xff] %v2492_v12  ;;  %2745 = vmatpush1.bf16.msra.mxu1 %v3694_v6  ;;  %v802_v2 = vrot.slane %v4081_v54, %v801_v62  ;;  %v814_v6 = vrot.slane %v4081_v54, %v813_v1 }
 0x245   :  { %3225 = vmatpush3.bf16.msra.mxu0 %v3698_v9  ;;  %v2453_v17 = vpop.f32.mrf.mxu1  ;;  %v2494_v18 = vpop.f32.mrf.mxu0  ;;  %2746 = vmatprep.subr.bf16.mxu1 %v3701_v10  ;;  %v810_v3 = vrot.slane %v4081_v54, %v809_v63 }
 0x246   :  { %3226 = vmatprep.subr.bf16.mxu0 %v3702_v13 }
 0x248   :  { %2747 = vmatpush1.bf16.msra.mxu1 %v3699_v16 }
 0x249   :  { %3227 = vmatpush3.bf16.msra.mxu0 %v3703_v19  ;;  %2748 = vmatprep.subr.bf16.mxu1 %v3706_v20  ;;  %v778_v19 = vld [vmem:[#allocation14 + $0x8] sm:$0xff] }
 0x24a   :  { %3228 = vmatprep.subr.bf16.mxu0 %v3707_v21  ;;  %v818_v54 = vrot.slane %v778_v19, %v4039_v22  ;;  %v826_v20 = vrot.slane %v778_v19, %v4079_v51 }
 0x24c   :  { %2749 = vmatpush1.bf16.msra.mxu1 %v3704_v37  ;;  %v830_v37 = vrot.slane %v778_v19, %v797_v56 }
 0x24d   :  { %3229 = vmatpush3.bf16.msra.mxu0 %v3708_v24  ;;  %2750 = vmatprep.subr.bf16.mxu1 %v3711_v25 }
 0x24e   :  { %3230 = vmatprep.subr.bf16.mxu0 %v3712_v26 }
 0x250   :  { %2751 = vmatpush1.bf16.msra.mxu1 %v3709_v27 }
 0x251   :  { %3231 = vmatpush3.bf16.msra.mxu0 %v3713_v28  ;;  %2752 = vmatprep.subr.bf16.mxu1 %v3716_v29 }
 0x252   :  { %3232 = vmatprep.subr.bf16.mxu0 %v3717_v30 }
 0x254   :  { %2753 = vmatpush1.bf16.msra.mxu1 %v3714_v31 }
 0x255   :  { %3233 = vmatpush3.bf16.msra.mxu0 %v3718_v32  ;;  %2754 = vmatprep.subr.bf16.mxu1 %v3721_v33 }
 0x256   :  { %3234 = vmatprep.subr.bf16.mxu0 %v3722_v34 }
 0x258   :  { %2755 = vmatpush1.bf16.msra.mxu1 %v3719_v35 }
 0x259   :  { %3235 = vmatpush3.bf16.msra.mxu0 %v3723_v36  ;;  %2756 = vmatprep.subr.bf16.mxu1 %v3726_v38 }
 0x25a   :  { %3236 = vmatprep.subr.bf16.mxu0 %v3727_v39 }
 0x25c   :  { %2757 = vmatpush1.bf16.msra.mxu1 %v3724_v41 }
 0x25d   :  { %3237 = vmatpush3.bf16.msra.mxu0 %v3728_v42  ;;  %2758 = vmatprep.subr.bf16.mxu1 %v3731_v43 }
 0x260   :  { %2816 = vmatmul.mubr.bf16.vlgmr.msra.gmra.mxu0 %v4062_v40  ;;  %2759 = vmatpush2.bf16.msra.mxu1 %v3729_v44 }
 0x261   :  { %2760 = vmatprep.subr.bf16.mxu1 %v3734_v45 }
 0x264   :  { %2761 = vmatpush2.bf16.msra.mxu1 %v3732_v46 }
 0x265   :  { %2762 = vmatprep.subr.bf16.mxu1 %v3737_v47 }
 0x268   :  { %2763 = vmatpush2.bf16.msra.mxu1 %v3735_v48 }
 0x269   :  { %2764 = vmatprep.subr.bf16.mxu1 %v3740_v49 }
 0x26c   :  { %2765 = vmatpush2.bf16.msra.mxu1 %v3738_v50 }
 0x26d   :  { %2766 = vmatprep.subr.bf16.mxu1 %v3743_v52 }
 0x270   :  { %2767 = vmatpush2.bf16.msra.mxu1 %v3741_v53 }
 0x271   :  { %2768 = vmatprep.subr.bf16.mxu1 %v3746_v55 }
 0x274   :  { %2769 = vmatpush2.bf16.msra.mxu1 %v3744_v57 }
 0x275   :  { %2770 = vmatprep.subr.bf16.mxu1 %v3749_v58 }
 0x278   :  { %2771 = vmatpush2.bf16.msra.mxu1 %v3747_v59 }
 0x279   :  { %2772 = vmatprep.subr.bf16.mxu1 %v3752_v60 }
 0x27c   :  { %2773 = vmatpush2.bf16.msra.mxu1 %v3750_v61 }
 0x27f   :  { %v2530_v7 = vpop.f32.mrf.mxu1  ;;  %v2571_v8 = vpop.f32.mrf.mxu0  ;;  %2775 = vmatmul.mubr.bf16.vlgmr.msra.gmra.mxu1 %v4062_v40  ;;  %v822_v40 = vrot.slane %v778_v19, %v4042_v23 }
 0x280   :  { %v2531_v9 = vadd.f32 %v2530_v7, %v802_v2  ;;  %v2572_v10 = vadd.f32 %v2571_v8, %v810_v3 }
 0x281   :  { %v2532_v11 = vpop.f32.mrf.mxu1  ;;  %v2573_v12 = vpop.f32.mrf.mxu0 }
 0x282   :  { %2827 = vst [vmem:[#allocation17 + $0x20] sm:$0xff] %v2531_v9  ;;  %2829 = vst [vmem:[#allocation17 + $0x30] sm:$0xff] %v2572_v10  ;;  %v2533_v13 = vadd.f32 %v2532_v11, %v806_v5  ;;  %v2574_v14 = vadd.f32 %v2573_v12, %v814_v6 }
 0x283   :  { %v2534_v15 = vpop.f32.mrf.mxu1  ;;  %v2575_v16 = vpop.f32.mrf.mxu0 }
 0x284   :  { %2828 = vst [vmem:[#allocation17 + $0x28] sm:$0xff] %v2533_v13  ;;  %2830 = vst [vmem:[#allocation17 + $0x38] sm:$0xff] %v2574_v14 }
 0x285   :  { %v2535_v17 = vpop.f32.mrf.mxu1  ;;  %v2576_v18 = vpop.f32.mrf.mxu0 }
 0x2bf   :  { %v2612_v21 = vpop.f32.mrf.mxu1 }
 0x2c0   :  { %v2613_v24 = vadd.f32 %v2612_v21, %v818_v54  ;;  %v2653_v25 = vpop.f32.mrf.mxu0 }
 0x2c1   :  { %v2654_v26 = vadd.f32 %v2653_v25, %v826_v20  ;;  %v2614_v27 = vpop.f32.mrf.mxu1 }
 0x2c2   :  { %2831 = vst [vmem:[#allocation17 + $0x40] sm:$0xff] %v2613_v24  ;;  %v2615_v28 = vadd.f32 %v2614_v27, %v822_v40  ;;  %v2655_v29 = vpop.f32.mrf.mxu0 }
 0x2c3   :  { %2833 = vst [vmem:[#allocation17 + $0x50] sm:$0xff] %v2654_v26  ;;  %v2656_v30 = vadd.f32 %v2655_v29, %v830_v37  ;;  %v2616_v31 = vpop.f32.mrf.mxu1 }
 0x2c4   :  { %2832 = vst [vmem:[#allocation17 + $0x48] sm:$0xff] %v2615_v28  ;;  %v2657_v32 = vpop.f32.mrf.mxu0 }
 0x2c5   :  { %2834 = vst [vmem:[#allocation17 + $0x58] sm:$0xff] %v2656_v30  ;;  %v2617_v33 = vpop.f32.mrf.mxu1 }
 0x2c6   :  { %v2658_v34 = vpop.f32.mrf.mxu0 }
 0x2c7   :  { %3908 = shalt.err (!%p3905_p6)
}
 0x2c8   :  { %2851 = dma.vmem_to_hbm [thread:$0]  %s2849_s22, 256, %s4128_s7, [#allocation5]   ;;  %v834_v4 = vrot.slane %v778_v19, %v801_v62  ;;  %v842_v56 = vrot.slane %v778_v19, %v809_v63  ;;  %v838_v35 = vrot.slane %v778_v19, %v805_v0  ;;  %v846_v38 = vrot.slane %v778_v19, %v813_v1  ;;  %v779_v52 = vld [vmem:[#allocation14 + $0x10] sm:$0x7] }
 0x2c9   :  { %v858_v55 = vrot.slane %v779_v52, %v4079_v51  ;;  %v850_v62 = vrot.slane %v779_v52, %v4039_v22  ;;  %v854_v63 = vrot.slane %v779_v52, %v4042_v23  ;;  %s3963_s7 = smov [#allocation17]  }
 0x2ca   :  { %s2858_s24 = sshll.u32 %s3963_s7, 4  ;;  %s2859_s24 = int_to_ptr.vmem [resolvable:$true] %s2858_s24 }
 0x2cb   :  { %s3917_s25 = scalar_lea.vmem %s2859_s24, 2432  ;;  %p3922_p8 = scmp.lt.s32.totalorder %s2859_s24, %s2859_s24 }
 0x2cc   :  { %p3918_p7 = scmp.ne.s32.totalorder %s2859_s24, %s3917_s25  ;;  %p3923_p9 = scmp.lt.s32.totalorder %s3917_s25, %s3917_s25 }
 0x2ce   :  { %p3924_p10 = por %p3923_p9, %p3922_p8 }
 0x2d0   :  { %p3925_p11 = pnand %p3924_p10, %p3918_p7 }
 0x2ff   :  { %v2694_v36 = vpop.f32.mrf.mxu1 }
 0x300   :  { %v2695_v39 = vadd.f32 %v2694_v36, %v834_v4  ;;  %v2735_v41 = vpop.f32.mrf.mxu0 }
 0x301   :  { %v2736_v42 = vadd.f32 %v2735_v41, %v842_v56  ;;  %v2696_v43 = vpop.f32.mrf.mxu1 }
 0x302   :  { %2835 = vst [vmem:[#allocation17 + $0x60] sm:$0xff] %v2695_v39  ;;  %v2697_v44 = vadd.f32 %v2696_v43, %v838_v35  ;;  %v2737_v45 = vpop.f32.mrf.mxu0 }
 0x303   :  { %2837 = vst [vmem:[#allocation17 + $0x70] sm:$0xff] %v2736_v42  ;;  %v2738_v46 = vadd.f32 %v2737_v45, %v846_v38  ;;  %v2698_v47 = vpop.f32.mrf.mxu1 }
 0x304   :  { %2836 = vst [vmem:[#allocation17 + $0x68] sm:$0xff] %v2697_v44  ;;  %v2739_v48 = vpop.f32.mrf.mxu0 }
 0x305   :  { %2838 = vst [vmem:[#allocation17 + $0x78] sm:$0xff] %v2738_v46  ;;  %v2699_v49 = vpop.f32.mrf.mxu1 }
 0x306   :  { %v2740_v50 = vpop.f32.mrf.mxu0 }
 0x320   :  { %v3238_v53 = vpop.f32.mrf.mxu0 }
 0x322   :  { %v3239_v57 = vpop.f32.mrf.mxu0 }
 0x323   :  { %v3240_v58 = vadd.f32 %v3239_v57, %v3238_v53 }
 0x324   :  { %v3241_v59 = vpop.f32.mrf.mxu0 }
 0x325   :  { %v2818_v60 = vadd.f32 %v3240_v58, %v858_v55 }
 0x326   :  { %v3242_v61 = vpop.f32.mrf.mxu0 }
 0x327   :  { %2841 = vst [vmem:[#allocation17 + $0x90] sm:$0xff] %v2818_v60 }
 0x33f   :  { %v2776_v0 = vpop.f32.mrf.mxu1 }
 0x340   :  { %v2777_v1 = vadd.f32 %v2776_v0, %v850_v62 }
 0x341   :  { %v2778_v2 = vpop.f32.mrf.mxu1 }
 0x342   :  { %2839 = vst [vmem:[#allocation17 + $0x80] sm:$0xff] %v2777_v1  ;;  %v2779_v3 = vadd.f32 %v2778_v2, %v854_v63 }
 0x343   :  { %v2780_v5 = vpop.f32.mrf.mxu1 }
 0x344   :  { %2840 = vst [vmem:[#allocation17 + $0x88] sm:$0xff] %v2779_v3 }
 0x345   :  { %v2781_v51 = vpop.f32.mrf.mxu1 }
 0x346   :  { %3928 = shalt.err (!%p3925_p11)
}
 0x347   :  { %2861 = dma.vmem_to_hbm [thread:$0]  %s2859_s24, 2432, %s4129_s8, [#allocation18]  }
 0x348   :  { %3947 = dma.done.wait [#allocation5], 256  }
 0x349   :  { %3948 = vsyncadd [#allocation5], 4294967040 }
 0x34a   :  { %3949 = dma.done.wait [#allocation18], 2432  }
 0x34b   :  { %3950 = vsyncadd [#allocation18], 4294964864 }
 0x34c   :  { %2868 = vsyncpa [#allocation4], 1 }
 0x34d   :  { %2869 = vsyncpa [#allocation9], 1 }
 0x34e   :  { %2870 = vsyncpa [#allocation12], 1 }
 0x34f   :  { %2871 = vsyncpa [#allocation15], 1 }
 0x350   :  { %2872 = vsyncpa [#allocation5], 1 }
 0x351   :  { %2873 = vsyncpa [#allocation18], 1 }
 0x352   :  { %2874 = vsyncpa [#allocation6], 1 }

</bundles_post_ra>
